<compile_context>
chip_gen: v6e
topology: v6e:2x2x1
jax: 0.10.0
libtpu: 0.0.40
codegen_flags: <defaults>
</compile_context>

<pallas_src>
import functools

import jax
import jax.numpy as jnp
from jax.experimental import pallas as pl
from jax.experimental.pallas import tpu as pltpu


LANE = 128      # lane width: output/channel dims are padded to this
GROUP = 8       # images per conv+GAP grid step (sublane-dense GAP rows)


def _round_up(x, m):
    return ((x + m - 1) // m) * m


def _full_spec(shape):
    """BlockSpec covering the full array (small operands on grid=(1,) calls)."""
    nd = len(shape)
    return pl.BlockSpec(shape, lambda i, _nd=nd: (0,) * _nd)


def _pad2(a, rows, cols):
    """Zero-pad a 2-D array into (rows, cols) at offset (0, 0)."""
    out = jnp.zeros((rows, cols), jnp.float32)
    return out.at[: a.shape[0], : a.shape[1]].set(a)


# ----------------------------------------------------------------------------
# Kernel 1: fused 3x3 conv (im2col GEMM, bf16 in / f32 acc) + bias + ReLU +
# global average pool. Grid = (image groups ["parallel"], HW tiles ["arbitrary"]).
# A VMEM accumulator carries per-image partial GAP sums across HW tiles, so only
# (n_img, CO_PAD) pooled rows ever reach HBM instead of the full feature map.
# ----------------------------------------------------------------------------
def conv_gap_kernel(p_ref, w_ref, b_ref, o_ref, acc_ref, *, group, tile_hw, hw):
    t = pl.program_id(1)

    @pl.when(t == 0)
    def _():
        acc_ref[...] = jnp.zeros_like(acc_ref)

    k = p_ref.shape[-1]
    p = p_ref[...].reshape(group * tile_hw, k)          # contiguous merge, no relayout
    y = jnp.dot(p, w_ref[...], preferred_element_type=jnp.float32)
    y = jnp.maximum(y + b_ref[...], 0.0)                # conv + bias + ReLU (f32)
    acc_ref[...] += jnp.sum(y.reshape(group, tile_hw, -1), axis=1)

    @pl.when(t == pl.num_programs(1) - 1)
    def _():
        o_ref[...] = acc_ref[...] * (1.0 / hw)          # finalize GAP (one row/image)


def conv_gap(patches, w, b, *, group, tile_hw, hw):
    n_img_pad, _, k = patches.shape
    co_pad = w.shape[1]
    kern = functools.partial(conv_gap_kernel, group=group, tile_hw=tile_hw, hw=hw)
    return pl.pallas_call(
        kern,
        out_shape=jax.ShapeDtypeStruct((n_img_pad, co_pad), jnp.float32),
        grid=(n_img_pad // group, hw // tile_hw),
        in_specs=[
            # Full-extent last dim (k = C*9): exempt from the 128-lane rule, so
            # the patch stream is not inflated to 128 lanes.
            pl.BlockSpec((group, tile_hw, k), lambda g, t: (g, t, 0)),
            pl.BlockSpec((k, co_pad), lambda g, t: (0, 0)),      # shared packed weights
            pl.BlockSpec((1, co_pad), lambda g, t: (0, 0)),      # shared packed bias
        ],
        out_specs=pl.BlockSpec((group, co_pad), lambda g, t: (g, 0)),
        scratch_shapes=[pltpu.VMEM((group, co_pad), jnp.float32)],
        compiler_params=pltpu.CompilerParams(
            dimension_semantics=("parallel", "arbitrary"),   # image axis -> megacore
            vmem_limit_bytes=32 * 1024 * 1024,               # > v5e's 16 MiB default
        ),
    )(patches, w, b)


# ----------------------------------------------------------------------------
# Kernel 2: NonLinearNeck (fc -> BN -> ReLU -> fc) for all 4 (branch, view)
# groups + predictor head + LatentPredictHead negative-cosine loss, fully fused.
# Views are stacked along M; online/target weights are block-diagonal along the
# output-column axis so each layer is ONE GEMM; BN stats stay per-group.
# ----------------------------------------------------------------------------
def _group_bn_relu(h, gamma, beta, n_view):
    """Train-mode BatchNorm (biased variance) + ReLU with statistics computed
    separately over rows [0, n_view) and [n_view, 2*n_view) — i.e. per
    (branch, view) group, since branches occupy disjoint column blocks."""
    ridx = jax.lax.broadcasted_iota(jnp.int32, h.shape, 0)
    m1 = (ridx < n_view).astype(jnp.float32)
    m2 = 1.0 - m1
    inv_n = 1.0 / n_view
    mu1 = jnp.sum(h * m1, axis=0, keepdims=True) * inv_n
    mu2 = jnp.sum(h * m2, axis=0, keepdims=True) * inv_n
    var1 = jnp.sum(((h - mu1) ** 2) * m1, axis=0, keepdims=True) * inv_n
    var2 = jnp.sum(((h - mu2) ** 2) * m2, axis=0, keepdims=True) * inv_n
    mu = m1 * mu1 + m2 * mu2
    var = m1 * var1 + m2 * var2
    hn = (h - mu) * jax.lax.rsqrt(var + 1e-5)
    return jnp.maximum(hn * gamma + beta, 0.0)
    # TODO(synk): torch BatchNorm1d also updates running_mean/var in train mode;
    # that stateful side effect is not reproduced here (loss value is unaffected).


def _l2_normalize(x):
    # torch F.normalize(dim=1): x / max(||x||_2, 1e-12)
    ssq = jnp.sum(x * x, axis=1, keepdims=True)
    return x * jax.lax.rsqrt(jnp.maximum(ssq, 1e-24))


def neck_pred_loss_kernel(x_ref, nw1_ref, nb1_ref, ng_ref, nbe_ref, nw2_ref,
                          nb2_ref, hw1_ref, hb1_ref, hg_ref, hbe_ref, hw2_ref,
                          hb2_ref, o_ref, *, n_view, d_pad):
    # ---- neck: both views stacked along M; online/target packed block-diag.
    x = x_ref[...]                                                # (2N, CO_PAD)
    h = jnp.dot(x, nw1_ref[...], preferred_element_type=jnp.float32) + nb1_ref[...]
    h = _group_bn_relu(h, ng_ref[...], nbe_ref[...], n_view)
    z = jnp.dot(h, nw2_ref[...], preferred_element_type=jnp.float32) + nb2_ref[...]
    p = z[:, :d_pad]          # online projections (rows: view1 then view2)
    zt = z[:, d_pad:]         # target projections (branch frozen outside)

    # ---- predictor head: both views as one GEMM per layer.
    hp = jnp.dot(p, hw1_ref[...], preferred_element_type=jnp.float32) + hb1_ref[...]
    hp = _group_bn_relu(hp, hg_ref[...], hbe_ref[...], n_view)
    q = jnp.dot(hp, hw2_ref[...], preferred_element_type=jnp.float32) + hb2_ref[...]

    # ---- negative-cosine loss with cross-view pairing, size-averaged:
    #      head(online_v1, target_v2) + head(online_v2, target_v1).
    qn = _l2_normalize(q)
    ztn = _l2_normalize(zt)
    g = jax.lax.dot_general(qn, ztn, (((1,), (1,)), ((), ())),
                            preferred_element_type=jnp.float32)   # (2N, 2N)
    rows = g.shape[0]
    ii = jax.lax.broadcasted_iota(jnp.int32, (rows, rows), 0)
    jj = jax.lax.broadcasted_iota(jnp.int32, (rows, rows), 1)
    pair = jj == ((ii + n_view) % rows)      # row i of q pairs with row (i+N)%2N of zt
    total = jnp.sum(jnp.where(pair, g, 0.0)) * (-2.0 / n_view)
    # Lane-dense (1, 128) store; element [0, 0] carries the scalar loss.
    o_ref[...] = jnp.full(o_ref.shape, total, jnp.float32)


def neck_pred_loss(args, *, n_view, d_pad):
    kern = functools.partial(neck_pred_loss_kernel, n_view=n_view, d_pad=d_pad)
    return pl.pallas_call(
        kern,
        out_shape=jax.ShapeDtypeStruct((1, LANE), jnp.float32),
        grid=(1,),
        in_specs=[_full_spec(a.shape) for a in args],
        out_specs=_full_spec((1, LANE)),
        compiler_params=pltpu.CompilerParams(dimension_semantics=("arbitrary",)),
    )(*args)


# ----------------------------------------------------------------------------
# Glue: im2col, parameter packing, forward composition
# ----------------------------------------------------------------------------
def im2col3x3(x):
    """x: (N, C, H, W) -> (N, H*W, C*9) patches for a 3x3 conv, pad=1, stride=1."""
    N, C, H, W = x.shape
    xp = jnp.pad(x, ((0, 0), (0, 0), (1, 1), (1, 1)))
    cols = [xp[:, :, dh:dh + H, dw:dw + W] for dh in range(3) for dw in range(3)]
    patches = jnp.stack(cols, axis=2)              # (N, C, 9, H, W)
    patches = patches.transpose(0, 3, 4, 1, 2)     # (N, H, W, C, 9)
    return patches.reshape(N, H * W, C * 9)
    # TODO(synk): a fully in-kernel shifted-window conv (9 shifted dot
    # accumulations on the raw (C,H,W) tile) would remove this 9x HBM patch
    # blow-up entirely; kept host-side here for robustness.


@jax.jit
def byol_forward_train(img, online, target, head):
    """img: (N, 2, C, H, W). Returns the scalar BYOL forward_train loss."""
    N, _, C, H, W = img.shape
    HW = H * W
    K = C * 9
    C2 = online["conv_w"].shape[1]
    hidden = online["neck_w1"].shape[1]
    D = online["neck_w2"].shape[1]

    co_pad = _round_up(2 * C2, LANE)     # online+target conv channels, lane-dense
    hid_pad = _round_up(hidden, LANE)    # (size to 256 on v6e/v7x if hidden grows)
    d_pad = _round_up(D, LANE)

    # Target branch is frozen (torch.no_grad / requires_grad=False).
    # TODO(synk): pallas_call is not differentiable; training this loss would
    # need a custom_vjp around the forward.
    target = jax.tree_util.tree_map(jax.lax.stop_gradient, target)

    # im2col once for both views (view-1 images first, then view-2); bf16 patch
    # stream with f32 MXU accumulation; image count padded to a GROUP multiple.
    x_all = jnp.concatenate([img[:, 0], img[:, 1]], axis=0)        # (2N, C, H, W)
    n_img = 2 * N
    n_img_pad = _round_up(n_img, GROUP)
    patches = im2col3x3(x_all).astype(jnp.bfloat16)                # (2N, HW, K)
    patches = jnp.pad(patches, ((0, n_img_pad - n_img), (0, 0), (0, 0)))

    # Online + target conv weights packed along the output-channel axis (bf16).
    conv_w = (jnp.zeros((K, co_pad), jnp.float32)
              .at[:, :C2].set(online["conv_w"])
              .at[:, C2:2 * C2].set(target["conv_w"])).astype(jnp.bfloat16)
    conv_b = (jnp.zeros((1, co_pad), jnp.float32)
              .at[:, :C2].set(online["conv_b"])
              .at[:, C2:2 * C2].set(target["conv_b"]))

    # HW tile: multiple of 16 sublanes (bf16) or the full HW extent; shrink for
    # large images to stay inside v7x/v5e scoped VMEM.
    tile_hw = 128 if HW % 128 == 0 else HW
    gap = conv_gap(patches, conv_w, conv_b, group=GROUP, tile_hw=tile_hw, hw=HW)
    x = gap[:n_img]                                    # (2N, co_pad), v1 rows then v2

    # Neck params: online/target packed block-diagonally so one GEMM per layer
    # serves both branches; padded rows/cols stay exactly zero end-to-end.
    def pack_row(on, tg, width, real):
        return (jnp.zeros((1, 2 * width), jnp.float32)
                .at[:, :real].set(on)
                .at[:, width:width + real].set(tg))

    nw1 = (jnp.zeros((co_pad, 2 * hid_pad), jnp.float32)
           .at[:C2, :hidden].set(online["neck_w1"])
           .at[C2:2 * C2, hid_pad:hid_pad + hidden].set(target["neck_w1"]))
    nb1 = pack_row(online["neck_b1"], target["neck_b1"], hid_pad, hidden)
    ng = pack_row(online["neck_g"], target["neck_g"], hid_pad, hidden)
    nbe = pack_row(online["neck_be"], target["neck_be"], hid_pad, hidden)
    nw2 = (jnp.zeros((2 * hid_pad, 2 * d_pad), jnp.float32)
           .at[:hidden, :D].set(online["neck_w2"])
           .at[hid_pad:hid_pad + hidden, d_pad:d_pad + D].set(target["neck_w2"]))
    nb2 = pack_row(online["neck_b2"], target["neck_b2"], d_pad, D)

    # Predictor head params, lane-padded (padded dims stay exactly zero).
    hw1 = _pad2(head["w1"], d_pad, hid_pad)
    hb1 = _pad2(head["b1"], 1, hid_pad)
    hg = _pad2(head["g"], 1, hid_pad)
    hbe = _pad2(head["be"], 1, hid_pad)
    hw2 = _pad2(head["w2"], hid_pad, d_pad)
    hb2 = _pad2(head["b2"], 1, d_pad)

    loss_row = neck_pred_loss(
        (x, nw1, nb1, ng, nbe, nw2, nb2, hw1, hb1, hg, hbe, hw2, hb2),
        n_view=N, d_pad=d_pad)
    return loss_row[0, 0]


def init_params(key, C, C2, hidden, D):
    ks = jax.random.split(key, 8)
    conv_w = 0.1 * jax.random.normal(ks[0], (C2, C, 3, 3), jnp.float32)
    params = dict(
        conv_w=conv_w.reshape(C2, C * 9).T,                        # (C*9, C2) for GEMM
        conv_b=0.01 * jax.random.normal(ks[1], (1, C2), jnp.float32),
        neck_w1=0.1 * jax.random.normal(ks[2], (C2, hidden), jnp.float32),
        neck_b1=jnp.zeros((1, hidden), jnp.float32),
        neck_g=jnp.ones((1, hidden), jnp.float32),
        neck_be=jnp.zeros((1, hidden), jnp.float32),
        neck_w2=0.1 * jax.random.normal(ks[3], (hidden, D), jnp.float32),
        neck_b2=jnp.zeros((1, D), jnp.float32),
    )
    head = dict(
        w1=0.1 * jax.random.normal(ks[4], (D, hidden), jnp.float32),
        b1=jnp.zeros((1, hidden), jnp.float32),
        g=jnp.ones((1, hidden), jnp.float32),
        be=jnp.zeros((1, hidden), jnp.float32),
        w2=0.1 * jax.random.normal(ks[5], (hidden, D), jnp.float32),
        b2=jnp.zeros((1, D), jnp.float32),
    )
    return params, head


if __name__ == "__main__":
    N, C, H, W = 2, 4, 16, 16
    C2, hidden, D = 8, 32, 16

    key = jax.random.PRNGKey(0)
    k_img, k_par = jax.random.split(key)

    img = jax.random.normal(k_img, (N, 2, C, H, W), jnp.float32)

    online, head = init_params(k_par, C, C2, hidden, D)
    # init_weights copies the online params into the target net; target frozen.
    target = jax.tree_util.tree_map(lambda x: x, online)
    # TODO(synk): momentum_update() of the target net is not part of forward();
    # it (and BN running-stat updates / pretrained loading) is omitted here.

    loss = byol_forward_train(img, online, target, head)
    jax.block_until_ready(loss)
    assert loss.shape == () and loss.dtype == jnp.float32
    print("KERNEL_OK")
</pallas_src>

<mosaic_0001>
module attributes {stable_mosaic.version = 11 : i64} {
  func.func @conv_gap_kernel(%arg0: i32, %arg1: i32, %arg2: memref<8x128x36xbf16, #tpu.memory_space<vmem>>, %arg3: memref<36x128xbf16, #tpu.memory_space<vmem>>, %arg4: memref<1x128xf32, #tpu.memory_space<vmem>>, %arg5: memref<8x128xf32, #tpu.memory_space<vmem>>, %arg6: memref<8x128xf32, #tpu.memory_space<vmem>>) attributes {dimension_semantics = [#tpu.dimension_semantics<parallel>, #tpu.dimension_semantics<arbitrary>], iteration_bounds = array<i64: 1, 2>, scalar_prefetch = 0 : i64, scratch_operands = 1 : i64, tpu.core_type = #tpu.core_type<tc>, window_params = [{transform_indices = @transform_0, window_bounds = array<i64: 8, 128, 36>}, {pipeline_mode = #tpu.pipeline_mode<synchronous>, transform_indices = @transform_1, window_bounds = array<i64: 36, 128>}, {pipeline_mode = #tpu.pipeline_mode<synchronous>, transform_indices = @transform_2, window_bounds = array<i64: 1, 128>}, {transform_indices = @transform_3, window_bounds = array<i64: 8, 128>}]} {
    %c0_i32 = arith.constant 0 : i32
    %0 = arith.cmpi eq, %arg1, %c0_i32 : i32
    %1 = arith.extui %0 : i1 to i32
    %c0_i32_0 = arith.constant 0 : i32
    %2 = arith.cmpi ne, %1, %c0_i32_0 : i32
    scf.if %2 {
      %cst_14 = arith.constant 0.000000e+00 : f32
      %20 = vector.broadcast %cst_14 : f32 to vector<8x128xf32>
      %c0_15 = arith.constant 0 : index
      %c0_16 = arith.constant 0 : index
      %21 = vector.load %arg6[%c0_15, %c0_16] : memref<8x128xf32, #tpu.memory_space<vmem>>, vector<8x128xf32>
      tpu.vector_store %arg6[%c0_15, %c0_16], %20 {strides = array<i32>} : memref<8x128xf32, #tpu.memory_space<vmem>>, vector<8x128xf32>,
    } else {
    }
    %c0 = arith.constant 0 : index
    %c0_1 = arith.constant 0 : index
    %c0_2 = arith.constant 0 : index
    %3 = vector.load %arg2[%c0, %c0_1, %c0_2] : memref<8x128x36xbf16, #tpu.memory_space<vmem>>, vector<8x128x36xbf16>
    %4 = vector.shape_cast %3 : vector<8x128x36xbf16> to vector<1024x36xbf16>
    %c0_3 = arith.constant 0 : index
    %c0_4 = arith.constant 0 : index
    %5 = vector.load %arg3[%c0_3, %c0_4] : memref<36x128xbf16, #tpu.memory_space<vmem>>, vector<36x128xbf16>
    %cst = arith.constant dense<0.000000e+00> : vector<1024x128xf32>
    %6 = tpu.matmul %4, %5, %cst {dimension_numbers = #tpu.dot_dimension_numbers<[1], [0], [0], [1], [0, 0, 1, 1], [], []>} : vector<1024x36xbf16>, vector<36x128xbf16>, vector<1024x128xf32> -> vector<1024x128xf32>
    %c0_5 = arith.constant 0 : index
    %c0_6 = arith.constant 0 : index
    %7 = vector.load %arg4[%c0_5, %c0_6] : memref<1x128xf32, #tpu.memory_space<vmem>>, vector<1x128xf32>
    %8 = vector.broadcast %7 : vector<1x128xf32> to vector<1024x128xf32>
    %9 = arith.addf %6, %8 : vector<1024x128xf32>
    %cst_7 = arith.constant 0.000000e+00 : f32
    %10 = vector.broadcast %cst_7 : f32 to vector<1024x128xf32>
    %11 = arith.maximumf %9, %10 : vector<1024x128xf32>
    %c0_8 = arith.constant 0 : index
    %c0_9 = arith.constant 0 : index
    %12 = vector.load %arg6[%c0_8, %c0_9] : memref<8x128xf32, #tpu.memory_space<vmem>>, vector<8x128xf32>
    %13 = vector.shape_cast %11 : vector<1024x128xf32> to vector<8x128x128xf32>
    %cst_10 = arith.constant dense<0.000000e+00> : vector<8x128xf32>
    %14 = vector.multi_reduction <add>, %13, %cst_10 [1] : vector<8x128x128xf32> to vector<8x128xf32>
    %15 = arith.addf %12, %14 : vector<8x128xf32>
    %c0_11 = arith.constant 0 : index
    %c0_12 = arith.constant 0 : index
    %16 = vector.load %arg6[%c0_11, %c0_12] : memref<8x128xf32, #tpu.memory_space<vmem>>, vector<8x128xf32>
    tpu.vector_store %arg6[%c0_11, %c0_12], %15 {strides = array<i32>} : memref<8x128xf32, #tpu.memory_space<vmem>>, vector<8x128xf32>,
    %c1_i32 = arith.constant 1 : i32
    %17 = arith.cmpi eq, %arg1, %c1_i32 : i32
    %18 = arith.extui %17 : i1 to i32
    %c0_i32_13 = arith.constant 0 : i32
    %19 = arith.cmpi ne, %18, %c0_i32_13 : i32
    scf.if %19 {
      %c0_14 = arith.constant 0 : index
      %c0_15 = arith.constant 0 : index
      %20 = vector.load %arg6[%c0_14, %c0_15] : memref<8x128xf32, #tpu.memory_space<vmem>>, vector<8x128xf32>
      %cst_16 = arith.constant 3.906250e-03 : f32
      %21 = vector.broadcast %cst_16 : f32 to vector<8x128xf32>
      %22 = arith.mulf %20, %21 : vector<8x128xf32>
      %c0_17 = arith.constant 0 : index
      %c0_18 = arith.constant 0 : index
      %23 = vector.load %arg5[%c0_17, %c0_18] : memref<8x128xf32, #tpu.memory_space<vmem>>, vector<8x128xf32>
      tpu.vector_store %arg5[%c0_17, %c0_18], %22 {strides = array<i32>} : memref<8x128xf32, #tpu.memory_space<vmem>>, vector<8x128xf32>,
    } else {
    }
    return
  }
  func.func @transform_0(%arg0: i32, %arg1: i32) -> (i32, i32, i32) {
    %c0_i32 = arith.constant 0 : i32
    %c0_i32_0 = arith.constant 0 : i32
    return %arg0, %arg1, %c0_i32 : i32, i32, i32
  }
  func.func @transform_1(%arg0: i32, %arg1: i32) -> (i32, i32) {
    %c0_i32 = arith.constant 0 : i32
    %c0_i32_0 = arith.constant 0 : i32
    %c0_i32_1 = arith.constant 0 : i32
    return %c0_i32, %c0_i32_0 : i32, i32
  }
  func.func @transform_2(%arg0: i32, %arg1: i32) -> (i32, i32) {
    %c0_i32 = arith.constant 0 : i32
    %c0_i32_0 = arith.constant 0 : i32
    %c0_i32_1 = arith.constant 0 : i32
    return %c0_i32, %c0_i32_0 : i32, i32
  }
  func.func @transform_3(%arg0: i32, %arg1: i32) -> (i32, i32) {
    %c0_i32 = arith.constant 0 : i32
    %c0_i32_0 = arith.constant 0 : i32
    return %arg0, %c0_i32 : i32, i32
  }
}

module attributes {stable_mosaic.version = 11 : i64} {
  func.func @neck_pred_loss_kernel(%arg0: i32, %arg1: memref<4x128xf32, #tpu.memory_space<vmem>>, %arg2: memref<128x256xf32, #tpu.memory_space<vmem>>, %arg3: memref<1x256xf32, #tpu.memory_space<vmem>>, %arg4: memref<1x256xf32, #tpu.memory_space<vmem>>, %arg5: memref<1x256xf32, #tpu.memory_space<vmem>>, %arg6: memref<256x256xf32, #tpu.memory_space<vmem>>, %arg7: memref<1x256xf32, #tpu.memory_space<vmem>>, %arg8: memref<128x128xf32, #tpu.memory_space<vmem>>, %arg9: memref<1x128xf32, #tpu.memory_space<vmem>>, %arg10: memref<1x128xf32, #tpu.memory_space<vmem>>, %arg11: memref<1x128xf32, #tpu.memory_space<vmem>>, %arg12: memref<128x128xf32, #tpu.memory_space<vmem>>, %arg13: memref<1x128xf32, #tpu.memory_space<vmem>>, %arg14: memref<1x128xf32, #tpu.memory_space<vmem>>) attributes {dimension_semantics = [#tpu.dimension_semantics<arbitrary>], iteration_bounds = array<i64: 1>, scalar_prefetch = 0 : i64, scratch_operands = 0 : i64, tpu.core_type = #tpu.core_type<tc>, window_params = [{pipeline_mode = #tpu.pipeline_mode<synchronous>, transform_indices = @transform_0, window_bounds = array<i64: 4, 128>}, {pipeline_mode = #tpu.pipeline_mode<synchronous>, transform_indices = @transform_1, window_bounds = array<i64: 128, 256>}, {pipeline_mode = #tpu.pipeline_mode<synchronous>, transform_indices = @transform_2, window_bounds = array<i64: 1, 256>}, {pipeline_mode = #tpu.pipeline_mode<synchronous>, transform_indices = @transform_3, window_bounds = array<i64: 1, 256>}, {pipeline_mode = #tpu.pipeline_mode<synchronous>, transform_indices = @transform_4, window_bounds = array<i64: 1, 256>}, {pipeline_mode = #tpu.pipeline_mode<synchronous>, transform_indices = @transform_5, window_bounds = array<i64: 256, 256>}, {pipeline_mode = #tpu.pipeline_mode<synchronous>, transform_indices = @transform_6, window_bounds = array<i64: 1, 256>}, {pipeline_mode = #tpu.pipeline_mode<synchronous>, transform_indices = @transform_7, window_bounds = array<i64: 128, 128>}, {pipeline_mode = #tpu.pipeline_mode<synchronous>, transform_indices = @transform_8, window_bounds = array<i64: 1, 128>}, {pipeline_mode = #tpu.pipeline_mode<synchronous>, transform_indices = @transform_9, window_bounds = array<i64: 1, 128>}, {pipeline_mode = #tpu.pipeline_mode<synchronous>, transform_indices = @transform_10, window_bounds = array<i64: 1, 128>}, {pipeline_mode = #tpu.pipeline_mode<synchronous>, transform_indices = @transform_11, window_bounds = array<i64: 128, 128>}, {pipeline_mode = #tpu.pipeline_mode<synchronous>, transform_indices = @transform_12, window_bounds = array<i64: 1, 128>}, {pipeline_mode = #tpu.pipeline_mode<synchronous>, transform_indices = @transform_13, window_bounds = array<i64: 1, 128>}]} {
    %c0 = arith.constant 0 : index
    %c0_0 = arith.constant 0 : index
    %0 = vector.load %arg1[%c0, %c0_0] : memref<4x128xf32, #tpu.memory_space<vmem>>, vector<4x128xf32>
    %c0_1 = arith.constant 0 : index
    %c0_2 = arith.constant 0 : index
    %1 = vector.load %arg2[%c0_1, %c0_2] : memref<128x256xf32, #tpu.memory_space<vmem>>, vector<128x256xf32>
    %cst = arith.constant dense<0.000000e+00> : vector<4x256xf32>
    %2 = tpu.matmul %0, %1, %cst {dimension_numbers = #tpu.dot_dimension_numbers<[1], [0], [0], [1], [0, 0, 1, 1], [], []>} : vector<4x128xf32>, vector<128x256xf32>, vector<4x256xf32> -> vector<4x256xf32>
    %c0_3 = arith.constant 0 : index
    %c0_4 = arith.constant 0 : index
    %3 = vector.load %arg3[%c0_3, %c0_4] : memref<1x256xf32, #tpu.memory_space<vmem>>, vector<1x256xf32>
    %4 = vector.broadcast %3 : vector<1x256xf32> to vector<4x256xf32>
    %5 = arith.addf %2, %4 : vector<4x256xf32>
    %c0_5 = arith.constant 0 : index
    %c0_6 = arith.constant 0 : index
    %6 = vector.load %arg4[%c0_5, %c0_6] : memref<1x256xf32, #tpu.memory_space<vmem>>, vector<1x256xf32>
    %c0_7 = arith.constant 0 : index
    %c0_8 = arith.constant 0 : index
    %7 = vector.load %arg5[%c0_7, %c0_8] : memref<1x256xf32, #tpu.memory_space<vmem>>, vector<1x256xf32>
    %8 = tpu.iota {dimensions = array<i32: 0>} : vector<4x256xi32>
    %c2_i32 = arith.constant 2 : i32
    %9 = vector.broadcast %c2_i32 : i32 to vector<4x256xi32>
    %10 = arith.cmpi slt, %8, %9 : vector<4x256xi32>
    %11 = arith.extui %10 : vector<4x256xi1> to vector<4x256xi32>
    %12 = arith.sitofp %11 : vector<4x256xi32> to vector<4x256xf32>
    %cst_9 = arith.constant 1.000000e+00 : f32
    %13 = vector.broadcast %cst_9 : f32 to vector<4x256xf32>
    %14 = arith.subf %13, %12 : vector<4x256xf32>
    %15 = arith.mulf %5, %12 : vector<4x256xf32>
    %cst_10 = arith.constant dense<0.000000e+00> : vector<256xf32>
    %16 = vector.multi_reduction <add>, %15, %cst_10 [0] : vector<4x256xf32> to vector<256xf32>
    %17 = vector.shape_cast %16 : vector<256xf32> to vector<1x256xf32>
    %cst_11 = arith.constant 5.000000e-01 : f32
    %18 = vector.broadcast %cst_11 : f32 to vector<1x256xf32>
    %19 = arith.mulf %17, %18 : vector<1x256xf32>
    %20 = arith.mulf %5, %14 : vector<4x256xf32>
    %cst_12 = arith.constant dense<0.000000e+00> : vector<256xf32>
    %21 = vector.multi_reduction <add>, %20, %cst_12 [0] : vector<4x256xf32> to vector<256xf32>
    %22 = vector.shape_cast %21 : vector<256xf32> to vector<1x256xf32>
    %cst_13 = arith.constant 5.000000e-01 : f32
    %23 = vector.broadcast %cst_13 : f32 to vector<1x256xf32>
    %24 = arith.mulf %22, %23 : vector<1x256xf32>
    %25 = vector.broadcast %19 : vector<1x256xf32> to vector<4x256xf32>
    %26 = arith.subf %5, %25 : vector<4x256xf32>
    %27 = arith.mulf %26, %26 : vector<4x256xf32>
    %28 = arith.mulf %27, %12 : vector<4x256xf32>
    %cst_14 = arith.constant dense<0.000000e+00> : vector<256xf32>
    %29 = vector.multi_reduction <add>, %28, %cst_14 [0] : vector<4x256xf32> to vector<256xf32>
    %30 = vector.shape_cast %29 : vector<256xf32> to vector<1x256xf32>
    %cst_15 = arith.constant 5.000000e-01 : f32
    %31 = vector.broadcast %cst_15 : f32 to vector<1x256xf32>
    %32 = arith.mulf %30, %31 : vector<1x256xf32>
    %33 = vector.broadcast %24 : vector<1x256xf32> to vector<4x256xf32>
    %34 = arith.subf %5, %33 : vector<4x256xf32>
    %35 = arith.mulf %34, %34 : vector<4x256xf32>
    %36 = arith.mulf %35, %14 : vector<4x256xf32>
    %cst_16 = arith.constant dense<0.000000e+00> : vector<256xf32>
    %37 = vector.multi_reduction <add>, %36, %cst_16 [0] : vector<4x256xf32> to vector<256xf32>
    %38 = vector.shape_cast %37 : vector<256xf32> to vector<1x256xf32>
    %cst_17 = arith.constant 5.000000e-01 : f32
    %39 = vector.broadcast %cst_17 : f32 to vector<1x256xf32>
    %40 = arith.mulf %38, %39 : vector<1x256xf32>
    %41 = vector.broadcast %19 : vector<1x256xf32> to vector<4x256xf32>
    %42 = arith.mulf %12, %41 : vector<4x256xf32>
    %43 = vector.broadcast %24 : vector<1x256xf32> to vector<4x256xf32>
    %44 = arith.mulf %14, %43 : vector<4x256xf32>
    %45 = arith.addf %42, %44 : vector<4x256xf32>
    %46 = vector.broadcast %32 : vector<1x256xf32> to vector<4x256xf32>
    %47 = arith.mulf %12, %46 : vector<4x256xf32>
    %48 = vector.broadcast %40 : vector<1x256xf32> to vector<4x256xf32>
    %49 = arith.mulf %14, %48 : vector<4x256xf32>
    %50 = arith.addf %47, %49 : vector<4x256xf32>
    %51 = arith.subf %5, %45 : vector<4x256xf32>
    %cst_18 = arith.constant 9.99999974E-6 : f32
    %52 = vector.broadcast %cst_18 : f32 to vector<4x256xf32>
    %53 = arith.addf %50, %52 : vector<4x256xf32>
    %54 = math.rsqrt %53 : vector<4x256xf32>
    %55 = arith.mulf %51, %54 : vector<4x256xf32>
    %56 = vector.broadcast %6 : vector<1x256xf32> to vector<4x256xf32>
    %57 = arith.mulf %55, %56 : vector<4x256xf32>
    %58 = vector.broadcast %7 : vector<1x256xf32> to vector<4x256xf32>
    %59 = arith.addf %57, %58 : vector<4x256xf32>
    %cst_19 = arith.constant 0.000000e+00 : f32
    %60 = vector.broadcast %cst_19 : f32 to vector<4x256xf32>
    %61 = arith.maximumf %59, %60 : vector<4x256xf32>
    %c0_20 = arith.constant 0 : index
    %c0_21 = arith.constant 0 : index
    %62 = vector.load %arg6[%c0_20, %c0_21] : memref<256x256xf32, #tpu.memory_space<vmem>>, vector<256x256xf32>
    %cst_22 = arith.constant dense<0.000000e+00> : vector<4x256xf32>
    %63 = tpu.matmul %61, %62, %cst_22 {dimension_numbers = #tpu.dot_dimension_numbers<[1], [0], [0], [1], [0, 0, 1, 1], [], []>} : vector<4x256xf32>, vector<256x256xf32>, vector<4x256xf32> -> vector<4x256xf32>
    %c0_23 = arith.constant 0 : index
    %c0_24 = arith.constant 0 : index
    %64 = vector.load %arg7[%c0_23, %c0_24] : memref<1x256xf32, #tpu.memory_space<vmem>>, vector<1x256xf32>
    %65 = vector.broadcast %64 : vector<1x256xf32> to vector<4x256xf32>
    %66 = arith.addf %63, %65 : vector<4x256xf32>
    %67 = vector.extract_strided_slice %66 {offsets = [0, 0], sizes = [4, 128], strides = [1, 1]} : vector<4x256xf32> to vector<4x128xf32>
    %68 = vector.extract_strided_slice %66 {offsets = [0, 128], sizes = [4, 128], strides = [1, 1]} : vector<4x256xf32> to vector<4x128xf32>
    %c0_25 = arith.constant 0 : index
    %c0_26 = arith.constant 0 : index
    %69 = vector.load %arg8[%c0_25, %c0_26] : memref<128x128xf32, #tpu.memory_space<vmem>>, vector<128x128xf32>
    %cst_27 = arith.constant dense<0.000000e+00> : vector<4x128xf32>
    %70 = tpu.matmul %67, %69, %cst_27 {dimension_numbers = #tpu.dot_dimension_numbers<[1], [0], [0], [1], [0, 0, 1, 1], [], []>} : vector<4x128xf32>, vector<128x128xf32>, vector<4x128xf32> -> vector<4x128xf32>
    %c0_28 = arith.constant 0 : index
    %c0_29 = arith.constant 0 : index
    %71 = vector.load %arg9[%c0_28, %c0_29] : memref<1x128xf32, #tpu.memory_space<vmem>>, vector<1x128xf32>
    %72 = vector.broadcast %71 : vector<1x128xf32> to vector<4x128xf32>
    %73 = arith.addf %70, %72 : vector<4x128xf32>
    %c0_30 = arith.constant 0 : index
    %c0_31 = arith.constant 0 : index
    %74 = vector.load %arg10[%c0_30, %c0_31] : memref<1x128xf32, #tpu.memory_space<vmem>>, vector<1x128xf32>
    %c0_32 = arith.constant 0 : index
    %c0_33 = arith.constant 0 : index
    %75 = vector.load %arg11[%c0_32, %c0_33] : memref<1x128xf32, #tpu.memory_space<vmem>>, vector<1x128xf32>
    %76 = tpu.iota {dimensions = array<i32: 0>} : vector<4x128xi32>
    %c2_i32_34 = arith.constant 2 : i32
    %77 = vector.broadcast %c2_i32_34 : i32 to vector<4x128xi32>
    %78 = arith.cmpi slt, %76, %77 : vector<4x128xi32>
    %79 = arith.extui %78 : vector<4x128xi1> to vector<4x128xi32>
    %80 = arith.sitofp %79 : vector<4x128xi32> to vector<4x128xf32>
    %cst_35 = arith.constant 1.000000e+00 : f32
    %81 = vector.broadcast %cst_35 : f32 to vector<4x128xf32>
    %82 = arith.subf %81, %80 : vector<4x128xf32>
    %83 = arith.mulf %73, %80 : vector<4x128xf32>
    %cst_36 = arith.constant dense<0.000000e+00> : vector<128xf32>
    %84 = vector.multi_reduction <add>, %83, %cst_36 [0] : vector<4x128xf32> to vector<128xf32>
    %85 = vector.shape_cast %84 : vector<128xf32> to vector<1x128xf32>
    %cst_37 = arith.constant 5.000000e-01 : f32
    %86 = vector.broadcast %cst_37 : f32 to vector<1x128xf32>
    %87 = arith.mulf %85, %86 : vector<1x128xf32>
    %88 = arith.mulf %73, %82 : vector<4x128xf32>
    %cst_38 = arith.constant dense<0.000000e+00> : vector<128xf32>
    %89 = vector.multi_reduction <add>, %88, %cst_38 [0] : vector<4x128xf32> to vector<128xf32>
    %90 = vector.shape_cast %89 : vector<128xf32> to vector<1x128xf32>
    %cst_39 = arith.constant 5.000000e-01 : f32
    %91 = vector.broadcast %cst_39 : f32 to vector<1x128xf32>
    %92 = arith.mulf %90, %91 : vector<1x128xf32>
    %93 = vector.broadcast %87 : vector<1x128xf32> to vector<4x128xf32>
    %94 = arith.subf %73, %93 : vector<4x128xf32>
    %95 = arith.mulf %94, %94 : vector<4x128xf32>
    %96 = arith.mulf %95, %80 : vector<4x128xf32>
    %cst_40 = arith.constant dense<0.000000e+00> : vector<128xf32>
    %97 = vector.multi_reduction <add>, %96, %cst_40 [0] : vector<4x128xf32> to vector<128xf32>
    %98 = vector.shape_cast %97 : vector<128xf32> to vector<1x128xf32>
    %cst_41 = arith.constant 5.000000e-01 : f32
    %99 = vector.broadcast %cst_41 : f32 to vector<1x128xf32>
    %100 = arith.mulf %98, %99 : vector<1x128xf32>
    %101 = vector.broadcast %92 : vector<1x128xf32> to vector<4x128xf32>
    %102 = arith.subf %73, %101 : vector<4x128xf32>
    %103 = arith.mulf %102, %102 : vector<4x128xf32>
    %104 = arith.mulf %103, %82 : vector<4x128xf32>
    %cst_42 = arith.constant dense<0.000000e+00> : vector<128xf32>
    %105 = vector.multi_reduction <add>, %104, %cst_42 [0] : vector<4x128xf32> to vector<128xf32>
    %106 = vector.shape_cast %105 : vector<128xf32> to vector<1x128xf32>
    %cst_43 = arith.constant 5.000000e-01 : f32
    %107 = vector.broadcast %cst_43 : f32 to vector<1x128xf32>
    %108 = arith.mulf %106, %107 : vector<1x128xf32>
    %109 = vector.broadcast %87 : vector<1x128xf32> to vector<4x128xf32>
    %110 = arith.mulf %80, %109 : vector<4x128xf32>
    %111 = vector.broadcast %92 : vector<1x128xf32> to vector<4x128xf32>
    %112 = arith.mulf %82, %111 : vector<4x128xf32>
    %113 = arith.addf %110, %112 : vector<4x128xf32>
    %114 = vector.broadcast %100 : vector<1x128xf32> to vector<4x128xf32>
    %115 = arith.mulf %80, %114 : vector<4x128xf32>
    %116 = vector.broadcast %108 : vector<1x128xf32> to vector<4x128xf32>
    %117 = arith.mulf %82, %116 : vector<4x128xf32>
    %118 = arith.addf %115, %117 : vector<4x128xf32>
    %119 = arith.subf %73, %113 : vector<4x128xf32>
    %cst_44 = arith.constant 9.99999974E-6 : f32
    %120 = vector.broadcast %cst_44 : f32 to vector<4x128xf32>
    %121 = arith.addf %118, %120 : vector<4x128xf32>
    %122 = math.rsqrt %121 : vector<4x128xf32>
    %123 = arith.mulf %119, %122 : vector<4x128xf32>
    %124 = vector.broadcast %74 : vector<1x128xf32> to vector<4x128xf32>
    %125 = arith.mulf %123, %124 : vector<4x128xf32>
    %126 = vector.broadcast %75 : vector<1x128xf32> to vector<4x128xf32>
    %127 = arith.addf %125, %126 : vector<4x128xf32>
    %cst_45 = arith.constant 0.000000e+00 : f32
    %128 = vector.broadcast %cst_45 : f32 to vector<4x128xf32>
    %129 = arith.maximumf %127, %128 : vector<4x128xf32>
    %c0_46 = arith.constant 0 : index
    %c0_47 = arith.constant 0 : index
    %130 = vector.load %arg12[%c0_46, %c0_47] : memref<128x128xf32, #tpu.memory_space<vmem>>, vector<128x128xf32>
    %cst_48 = arith.constant dense<0.000000e+00> : vector<4x128xf32>
    %131 = tpu.matmul %129, %130, %cst_48 {dimension_numbers = #tpu.dot_dimension_numbers<[1], [0], [0], [1], [0, 0, 1, 1], [], []>} : vector<4x128xf32>, vector<128x128xf32>, vector<4x128xf32> -> vector<4x128xf32>
    %c0_49 = arith.constant 0 : index
    %c0_50 = arith.constant 0 : index
    %132 = vector.load %arg13[%c0_49, %c0_50] : memref<1x128xf32, #tpu.memory_space<vmem>>, vector<1x128xf32>
    %133 = vector.broadcast %132 : vector<1x128xf32> to vector<4x128xf32>
    %134 = arith.addf %131, %133 : vector<4x128xf32>
    %135 = arith.mulf %134, %134 : vector<4x128xf32>
    %cst_51 = arith.constant dense<0.000000e+00> : vector<4xf32>
    %136 = vector.multi_reduction <add>, %135, %cst_51 [1] : vector<4x128xf32> to vector<4xf32>
    %137 = vector.shape_cast %136 : vector<4xf32> to vector<4x1xf32>
    %cst_52 = arith.constant 1.000000e-24 : f32
    %138 = vector.broadcast %cst_52 : f32 to vector<4x1xf32>
    %139 = arith.maximumf %137, %138 : vector<4x1xf32>
    %140 = math.rsqrt %139 : vector<4x1xf32>
    %141 = vector.broadcast %140 : vector<4x1xf32> to vector<4x128xf32>
    %142 = arith.mulf %134, %141 : vector<4x128xf32>
    %143 = arith.mulf %68, %68 : vector<4x128xf32>
    %cst_53 = arith.constant dense<0.000000e+00> : vector<4xf32>
    %144 = vector.multi_reduction <add>, %143, %cst_53 [1] : vector<4x128xf32> to vector<4xf32>
    %145 = vector.shape_cast %144 : vector<4xf32> to vector<4x1xf32>
    %cst_54 = arith.constant 1.000000e-24 : f32
    %146 = vector.broadcast %cst_54 : f32 to vector<4x1xf32>
    %147 = arith.maximumf %145, %146 : vector<4x1xf32>
    %148 = math.rsqrt %147 : vector<4x1xf32>
    %149 = vector.broadcast %148 : vector<4x1xf32> to vector<4x128xf32>
    %150 = arith.mulf %68, %149 : vector<4x128xf32>
    %cst_55 = arith.constant dense<0.000000e+00> : vector<4x4xf32>
    %151 = tpu.matmul %142, %150, %cst_55 {dimension_numbers = #tpu.dot_dimension_numbers<[1], [1], [0], [0], [0, 0, 1, 0], [], []>} : vector<4x128xf32>, vector<4x128xf32>, vector<4x4xf32> -> vector<4x4xf32>
    %152 = tpu.iota {dimensions = array<i32: 0>} : vector<4x4xi32>
    %153 = tpu.iota {dimensions = array<i32: 1>} : vector<4x4xi32>
    %c2_i32_56 = arith.constant 2 : i32
    %154 = vector.broadcast %c2_i32_56 : i32 to vector<4x4xi32>
    %155 = arith.addi %152, %154 : vector<4x4xi32>
    %c4_i32 = arith.constant 4 : i32
    %c0_i32 = arith.constant 0 : i32
    %156 = arith.cmpi eq, %c4_i32, %c0_i32 : i32
    %c1_i32 = arith.constant 1 : i32
    %157 = arith.select %156, %c1_i32, %c4_i32 : i32
    %158 = vector.broadcast %157 : i32 to vector<4x4xi32>
    %159 = arith.remsi %155, %158 : vector<4x4xi32>
    %c0_i32_57 = arith.constant 0 : i32
    %160 = vector.broadcast %c0_i32_57 : i32 to vector<4x4xi32>
    %161 = arith.cmpi ne, %159, %160 : vector<4x4xi32>
    %c0_i32_58 = arith.constant 0 : i32
    %162 = vector.broadcast %c0_i32_58 : i32 to vector<4x4xi32>
    %163 = arith.cmpi slt, %159, %162 : vector<4x4xi32>
    %c0_i32_59 = arith.constant 0 : i32
    %164 = arith.cmpi slt, %157, %c0_i32_59 : i32
    %165 = vector.broadcast %164 : i1 to vector<4x4xi1>
    %166 = vector.broadcast %165 : vector<4x4xi1> to vector<4x4xi1>
    %167 = arith.xori %163, %166 : vector<4x4xi1>
    %168 = arith.andi %167, %161 : vector<4x4xi1>
    %169 = vector.broadcast %157 : i32 to vector<4x4xi32>
    %170 = arith.addi %159, %169 : vector<4x4xi32>
    %171 = arith.select %168, %170, %159 : vector<4x4xi1>, vector<4x4xi32>
    %172 = arith.cmpi eq, %153, %171 : vector<4x4xi32>
    %cst_60 = arith.constant 0.000000e+00 : f32
    %173 = vector.broadcast %cst_60 : f32 to vector<4x4xf32>
    %174 = arith.select %172, %151, %173 : vector<4x4xi1>, vector<4x4xf32>
    %175 = vector.shape_cast %174 : vector<4x4xf32> to vector<1x4x4xf32>
    %cst_61 = arith.constant dense<0.000000e+00> : vector<1xf32>
    %176 = vector.multi_reduction <add>, %175, %cst_61 [1, 2] : vector<1x4x4xf32> to vector<1xf32>
    %177 = vector.shape_cast %176 : vector<1xf32> to vector<1x1x1xf32>
    %178 = vector.extract %177[0, 0, 0] : f32 from vector<1x1x1xf32>
    %cst_62 = arith.constant -1.000000e+00 : f32
    %179 = arith.mulf %178, %cst_62 : f32
    %180 = vector.broadcast %179 : f32 to vector<1x128xf32>
    %c0_63 = arith.constant 0 : index
    %c0_64 = arith.constant 0 : index
    %181 = vector.load %arg14[%c0_63, %c0_64] : memref<1x128xf32, #tpu.memory_space<vmem>>, vector<1x128xf32>
    tpu.vector_store %arg14[%c0_63, %c0_64], %180 {strides = array<i32>} : memref<1x128xf32, #tpu.memory_space<vmem>>, vector<1x128xf32>,
    return
  }
  func.func @transform_0(%arg0: i32) -> (i32, i32) {
    %c0_i32 = arith.constant 0 : i32
    %c0_i32_0 = arith.constant 0 : i32
    %c0_i32_1 = arith.constant 0 : i32
    return %c0_i32, %c0_i32_0 : i32, i32
  }
  func.func @transform_1(%arg0: i32) -> (i32, i32) {
    %c0_i32 = arith.constant 0 : i32
    %c0_i32_0 = arith.constant 0 : i32
    %c0_i32_1 = arith.constant 0 : i32
    return %c0_i32, %c0_i32_0 : i32, i32
  }
  func.func @transform_2(%arg0: i32) -> (i32, i32) {
    %c0_i32 = arith.constant 0 : i32
    %c0_i32_0 = arith.constant 0 : i32
    %c0_i32_1 = arith.constant 0 : i32
    return %c0_i32, %c0_i32_0 : i32, i32
  }
  func.func @transform_3(%arg0: i32) -> (i32, i32) {
    %c0_i32 = arith.constant 0 : i32
    %c0_i32_0 = arith.constant 0 : i32
    %c0_i32_1 = arith.constant 0 : i32
    return %c0_i32, %c0_i32_0 : i32, i32
  }
  func.func @transform_4(%arg0: i32) -> (i32, i32) {
    %c0_i32 = arith.constant 0 : i32
    %c0_i32_0 = arith.constant 0 : i32
    %c0_i32_1 = arith.constant 0 : i32
    return %c0_i32, %c0_i32_0 : i32, i32
  }
  func.func @transform_5(%arg0: i32) -> (i32, i32) {
    %c0_i32 = arith.constant 0 : i32
    %c0_i32_0 = arith.constant 0 : i32
    %c0_i32_1 = arith.constant 0 : i32
    return %c0_i32, %c0_i32_0 : i32, i32
  }
  func.func @transform_6(%arg0: i32) -> (i32, i32) {
    %c0_i32 = arith.constant 0 : i32
    %c0_i32_0 = arith.constant 0 : i32
    %c0_i32_1 = arith.constant 0 : i32
    return %c0_i32, %c0_i32_0 : i32, i32
  }
  func.func @transform_7(%arg0: i32) -> (i32, i32) {
    %c0_i32 = arith.constant 0 : i32
    %c0_i32_0 = arith.constant 0 : i32
    %c0_i32_1 = arith.constant 0 : i32
    return %c0_i32, %c0_i32_0 : i32, i32
  }
  func.func @transform_8(%arg0: i32) -> (i32, i32) {
    %c0_i32 = arith.constant 0 : i32
    %c0_i32_0 = arith.constant 0 : i32
    %c0_i32_1 = arith.constant 0 : i32
    return %c0_i32, %c0_i32_0 : i32, i32
  }
  func.func @transform_9(%arg0: i32) -> (i32, i32) {
    %c0_i32 = arith.constant 0 : i32
    %c0_i32_0 = arith.constant 0 : i32
    %c0_i32_1 = arith.constant 0 : i32
    return %c0_i32, %c0_i32_0 : i32, i32
  }
  func.func @transform_10(%arg0: i32) -> (i32, i32) {
    %c0_i32 = arith.constant 0 : i32
    %c0_i32_0 = arith.constant 0 : i32
    %c0_i32_1 = arith.constant 0 : i32
    return %c0_i32, %c0_i32_0 : i32, i32
  }
  func.func @transform_11(%arg0: i32) -> (i32, i32) {
    %c0_i32 = arith.constant 0 : i32
    %c0_i32_0 = arith.constant 0 : i32
    %c0_i32_1 = arith.constant 0 : i32
    return %c0_i32, %c0_i32_0 : i32, i32
  }
  func.func @transform_12(%arg0: i32) -> (i32, i32) {
    %c0_i32 = arith.constant 0 : i32
    %c0_i32_0 = arith.constant 0 : i32
    %c0_i32_1 = arith.constant 0 : i32
    return %c0_i32, %c0_i32_0 : i32, i32
  }
  func.func @transform_13(%arg0: i32) -> (i32, i32) {
    %c0_i32 = arith.constant 0 : i32
    %c0_i32_0 = arith.constant 0 : i32
    %c0_i32_1 = arith.constant 0 : i32
    return %c0_i32, %c0_i32_0 : i32, i32
  }
}

</mosaic_0001>

<bundles_post_ra>
// kernel: byol_forward_train.2
= control target key start
LH: loop header
LB: loop body
LE: loop exit
PB: predicated region body
PF: predicated region fallthrough
CT: control target
= control target key end

     0   :  { %s2884_s12 = smov 0   ;;  %s2886_s13 = smov 0   ;;  %s3381_s0 = inlined_call_operand.vmem [shape: bf16[8,256,36], index: 0, kind: input, shape index: {}]   ;;  %s3382_s1 = inlined_call_operand.vmem [shape: bf16[36,128], index: 1, kind: input, shape index: {}]   ;;  %s3383_s2 = inlined_call_operand.vmem [shape: f32[1,128], index: 2, kind: input, shape index: {}]   ;;  %s3384_s3 = inlined_call_operand.vmem [shape: f32[8,128], index: 3, kind: output, shape index: {}]  }
   0x1   :  { %s2888_s14 = smov 0   ;;  %s2890_s15 = smov 0  }
   0x2   :  { %s2892_s16 = smov 0  }
   0x3 LB: > { %s22_s17 = sadd.s32 1, %s2857_s15  ;;  %p41_p1 = scmp.ne.s32.totalorder %s2849_s13, %s2845_s12  ;;  %s2861_s16 = sphi %s2892_s16, %s13_s16   ;;  %s2857_s15 = sphi %s2890_s15, %s3388_s15   ;;  %s2853_s14 = sphi %s2888_s14, %s3387_s14   ;;  %s2849_s13 = sphi %s2886_s13, %s3386_s13   ;;  %s2845_s12 = sphi %s2884_s12, %s3385_s12  }
   0x4   : > { %p23_p0 = scmp.ge.s32.totalorder %s22_s17, 2  ;;  %p42_p2 = scmp.eq.s32.totalorder %s2861_s16, 0 }
   0x5   : > { %s34_s19 = sadd.s32 1, %s2849_s13  ;;  %p2362_p5 = scmp.ge.s32.totalorder %s2861_s16, 2 }
   0x6   : > { %s3390_s17 = smov (%p23_p0, %s22_s17), 0  ;;  %p43_p3 = por %p42_p2, %p41_p1 }
   0x7   : > { %s30_s18 = ssub.s32 %s2857_s15, %s3390_s17  ;;  %141 = sbr.rel (%p2362_p5) target bundleno = 48 (0x30), region = 24 }
   0x8   : > { %p32_p4 = scmp.eq.s32.totalorder %s30_s18, 0 }
   0xa   : > { %s2919_s20 = scalar_select %p32_p4, %s2849_s13, %s34_s19  }
   0xc   : > { %144 = sbr.rel (!%p43_p3) target bundleno = 48 (0x30), region = 28  ;;  %s146_s21 = sand.u32 (%p43_p3), 1, %s2849_s13  }
   0xd   : > { %s2505_s22 = sshll.u32 (%p43_p3), %s2857_s15, 6  ;;  %s2363_s23 = sshll.u32 (%p43_p3), %s146_s21, 9 }
   0xe   : > { %s2927_s26 = scalar_lea.vmem (%p43_p3), %s3381_s0, %s2505_s22  ;;  %s2932_s27 = scalar_lea.vmem (%p43_p3), [#allocation3], %s2363_s23 }
   0xf   : > { %v171_v0 = vld [vmem:[%s2927_s26] sm:$0xff] (%p43_p3)   ;;  %v175_v1 = vld [vmem:[%s2927_s26 + $0x8] sm:$0xff] (%p43_p3)   ;;  %v179_v2 = vld [vmem:[%s2927_s26 + $0x10] sm:$0xff] (%p43_p3)  }
  0x10   : > { %172 = vst [vmem:[%s2932_s27] sm:$0xff] (%p43_p3), %v171_v0   ;;  %176 = vst [vmem:[%s2932_s27 + $0x8] sm:$0xff] (%p43_p3), %v175_v1   ;;  %v183_v3 = vld [vmem:[%s2927_s26 + $0x18] sm:$0xff] (%p43_p3)   ;;  %v187_v4 = vld [vmem:[%s2927_s26 + $0x20] sm:$0xff] (%p43_p3)  }
  0x11   : > { %180 = vst [vmem:[%s2932_s27 + $0x10] sm:$0xff] %v179_v2   ;;  %v191_v5 = vld [vmem:[%s2927_s26 + $0x28] sm:$0xff]   ;;  %184 = vst [vmem:[%s2932_s27 + $0x18] sm:$0xff] %v183_v3   ;;  %v195_v6 = vld [vmem:[%s2927_s26 + $0x30] sm:$0xff]  }
  0x12   : > { %188 = vst [vmem:[%s2932_s27 + $0x20] sm:$0xff] %v187_v4   ;;  %192 = vst [vmem:[%s2932_s27 + $0x28] sm:$0xff] %v191_v5   ;;  %v199_v7 = vld [vmem:[%s2927_s26 + $0x38] sm:$0xff]   ;;  %v203_v8 = vld [vmem:[%s2927_s26 + $0x80] sm:$0xff]  }
  0x13   : > { %196 = vst [vmem:[%s2932_s27 + $0x30] sm:$0xff] %v195_v6   ;;  %200 = vst [vmem:[%s2932_s27 + $0x38] sm:$0xff] %v199_v7   ;;  %v207_v9 = vld [vmem:[%s2927_s26 + $0x88] sm:$0xff]   ;;  %v211_v10 = vld [vmem:[%s2927_s26 + $0x90] sm:$0xff]  }
  0x14   : > { %204 = vst [vmem:[%s2932_s27 + $0x40] sm:$0xff] %v203_v8   ;;  %v215_v11 = vld [vmem:[%s2927_s26 + $0x98] sm:$0xff]   ;;  %208 = vst [vmem:[%s2932_s27 + $0x48] sm:$0xff] %v207_v9   ;;  %v219_v12 = vld [vmem:[%s2927_s26 + $0xa0] sm:$0xff]  }
  0x15   : > { %212 = vst [vmem:[%s2932_s27 + $0x50] sm:$0xff] %v211_v10   ;;  %216 = vst [vmem:[%s2932_s27 + $0x58] sm:$0xff] %v215_v11   ;;  %v223_v13 = vld [vmem:[%s2927_s26 + $0xa8] sm:$0xff]   ;;  %v227_v14 = vld [vmem:[%s2927_s26 + $0xb0] sm:$0xff]  }
  0x16   : > { %220 = vst [vmem:[%s2932_s27 + $0x60] sm:$0xff] %v219_v12   ;;  %224 = vst [vmem:[%s2932_s27 + $0x68] sm:$0xff] %v223_v13   ;;  %v231_v15 = vld [vmem:[%s2927_s26 + $0xb8] sm:$0xff]   ;;  %v235_v16 = vld [vmem:[%s2927_s26 + $0x100] sm:$0xff]  }
  0x17   : > { %228 = vst [vmem:[%s2932_s27 + $0x70] sm:$0xff] %v227_v14   ;;  %v239_v17 = vld [vmem:[%s2927_s26 + $0x108] sm:$0xff]   ;;  %232 = vst [vmem:[%s2932_s27 + $0x78] sm:$0xff] %v231_v15   ;;  %v243_v18 = vld [vmem:[%s2927_s26 + $0x110] sm:$0xff]  }
  0x18   : > { %236 = vst [vmem:[%s2932_s27 + $0x80] sm:$0xff] %v235_v16   ;;  %240 = vst [vmem:[%s2932_s27 + $0x88] sm:$0xff] %v239_v17   ;;  %v247_v19 = vld [vmem:[%s2927_s26 + $0x118] sm:$0xff]   ;;  %v251_v20 = vld [vmem:[%s2927_s26 + $0x120] sm:$0xff]  }
  0x19   : > { %244 = vst [vmem:[%s2932_s27 + $0x90] sm:$0xff] %v243_v18   ;;  %248 = vst [vmem:[%s2932_s27 + $0x98] sm:$0xff] %v247_v19   ;;  %v255_v21 = vld [vmem:[%s2927_s26 + $0x128] sm:$0xff]   ;;  %v259_v22 = vld [vmem:[%s2927_s26 + $0x130] sm:$0xff]  }
  0x1a   : > { %252 = vst [vmem:[%s2932_s27 + $0xa0] sm:$0xff] %v251_v20   ;;  %v263_v23 = vld [vmem:[%s2927_s26 + $0x138] sm:$0xff]   ;;  %256 = vst [vmem:[%s2932_s27 + $0xa8] sm:$0xff] %v255_v21   ;;  %v267_v24 = vld [vmem:[%s2927_s26 + $0x180] sm:$0xff]  }
  0x1b   : > { %260 = vst [vmem:[%s2932_s27 + $0xb0] sm:$0xff] %v259_v22   ;;  %264 = vst [vmem:[%s2932_s27 + $0xb8] sm:$0xff] %v263_v23   ;;  %v271_v25 = vld [vmem:[%s2927_s26 + $0x188] sm:$0xff]   ;;  %v275_v26 = vld [vmem:[%s2927_s26 + $0x190] sm:$0xff]  }
  0x1c   : > { %268 = vst [vmem:[%s2932_s27 + $0xc0] sm:$0xff] %v267_v24   ;;  %272 = vst [vmem:[%s2932_s27 + $0xc8] sm:$0xff] %v271_v25   ;;  %v279_v27 = vld [vmem:[%s2927_s26 + $0x198] sm:$0xff]   ;;  %v283_v28 = vld [vmem:[%s2927_s26 + $0x1a0] sm:$0xff]  }
  0x1d   : > { %276 = vst [vmem:[%s2932_s27 + $0xd0] sm:$0xff] %v275_v26   ;;  %v287_v29 = vld [vmem:[%s2927_s26 + $0x1a8] sm:$0xff]   ;;  %280 = vst [vmem:[%s2932_s27 + $0xd8] sm:$0xff] %v279_v27   ;;  %v291_v30 = vld [vmem:[%s2927_s26 + $0x1b0] sm:$0xff]  }
  0x1e   : > { %284 = vst [vmem:[%s2932_s27 + $0xe0] sm:$0xff] %v283_v28   ;;  %288 = vst [vmem:[%s2932_s27 + $0xe8] sm:$0xff] %v287_v29   ;;  %v295_v31 = vld [vmem:[%s2927_s26 + $0x1b8] sm:$0xff]   ;;  %v299_v32 = vld [vmem:[%s2927_s26 + $0x200] sm:$0xff]  }
  0x1f   : > { %292 = vst [vmem:[%s2932_s27 + $0xf0] sm:$0xff] %v291_v30   ;;  %296 = vst [vmem:[%s2932_s27 + $0xf8] sm:$0xff] %v295_v31   ;;  %v303_v33 = vld [vmem:[%s2927_s26 + $0x208] sm:$0xff]   ;;  %v307_v34 = vld [vmem:[%s2927_s26 + $0x210] sm:$0xff]  }
  0x20   : > { %300 = vst [vmem:[%s2932_s27 + $0x100] sm:$0xff] %v299_v32   ;;  %v311_v35 = vld [vmem:[%s2927_s26 + $0x218] sm:$0xff]   ;;  %304 = vst [vmem:[%s2932_s27 + $0x108] sm:$0xff] %v303_v33   ;;  %v315_v36 = vld [vmem:[%s2927_s26 + $0x220] sm:$0xff]  }
  0x21   : > { %308 = vst [vmem:[%s2932_s27 + $0x110] sm:$0xff] %v307_v34   ;;  %312 = vst [vmem:[%s2932_s27 + $0x118] sm:$0xff] %v311_v35   ;;  %v319_v37 = vld [vmem:[%s2927_s26 + $0x228] sm:$0xff]   ;;  %v323_v38 = vld [vmem:[%s2927_s26 + $0x230] sm:$0xff]  }
  0x22   : > { %316 = vst [vmem:[%s2932_s27 + $0x120] sm:$0xff] %v315_v36   ;;  %320 = vst [vmem:[%s2932_s27 + $0x128] sm:$0xff] %v319_v37   ;;  %v327_v39 = vld [vmem:[%s2927_s26 + $0x238] sm:$0xff]   ;;  %v331_v40 = vld [vmem:[%s2927_s26 + $0x280] sm:$0xff]  }
  0x23   : > { %324 = vst [vmem:[%s2932_s27 + $0x130] sm:$0xff] %v323_v38   ;;  %v335_v41 = vld [vmem:[%s2927_s26 + $0x288] sm:$0xff]   ;;  %328 = vst [vmem:[%s2932_s27 + $0x138] sm:$0xff] %v327_v39   ;;  %v339_v42 = vld [vmem:[%s2927_s26 + $0x290] sm:$0xff]  }
  0x24   : > { %332 = vst [vmem:[%s2932_s27 + $0x140] sm:$0xff] %v331_v40   ;;  %336 = vst [vmem:[%s2932_s27 + $0x148] sm:$0xff] %v335_v41   ;;  %v343_v43 = vld [vmem:[%s2927_s26 + $0x298] sm:$0xff]   ;;  %v347_v44 = vld [vmem:[%s2927_s26 + $0x2a0] sm:$0xff]  }
  0x25   : > { %340 = vst [vmem:[%s2932_s27 + $0x150] sm:$0xff] %v339_v42   ;;  %344 = vst [vmem:[%s2932_s27 + $0x158] sm:$0xff] %v343_v43   ;;  %v351_v45 = vld [vmem:[%s2927_s26 + $0x2a8] sm:$0xff]   ;;  %v355_v46 = vld [vmem:[%s2927_s26 + $0x2b0] sm:$0xff]  }
  0x26   : > { %348 = vst [vmem:[%s2932_s27 + $0x160] sm:$0xff] %v347_v44   ;;  %v359_v47 = vld [vmem:[%s2927_s26 + $0x2b8] sm:$0xff]   ;;  %352 = vst [vmem:[%s2932_s27 + $0x168] sm:$0xff] %v351_v45   ;;  %v363_v48 = vld [vmem:[%s2927_s26 + $0x300] sm:$0xff]  }
  0x27   : > { %356 = vst [vmem:[%s2932_s27 + $0x170] sm:$0xff] %v355_v46   ;;  %360 = vst [vmem:[%s2932_s27 + $0x178] sm:$0xff] %v359_v47   ;;  %v367_v49 = vld [vmem:[%s2927_s26 + $0x308] sm:$0xff]   ;;  %v371_v50 = vld [vmem:[%s2927_s26 + $0x310] sm:$0xff]  }
  0x28   : > { %364 = vst [vmem:[%s2932_s27 + $0x180] sm:$0xff] %v363_v48   ;;  %368 = vst [vmem:[%s2932_s27 + $0x188] sm:$0xff] %v367_v49   ;;  %v375_v51 = vld [vmem:[%s2927_s26 + $0x318] sm:$0xff]   ;;  %v379_v52 = vld [vmem:[%s2927_s26 + $0x320] sm:$0xff]  }
  0x29   : > { %372 = vst [vmem:[%s2932_s27 + $0x190] sm:$0xff] %v371_v50   ;;  %v383_v53 = vld [vmem:[%s2927_s26 + $0x328] sm:$0xff]   ;;  %376 = vst [vmem:[%s2932_s27 + $0x198] sm:$0xff] %v375_v51   ;;  %v387_v54 = vld [vmem:[%s2927_s26 + $0x330] sm:$0xff]  }
  0x2a   : > { %380 = vst [vmem:[%s2932_s27 + $0x1a0] sm:$0xff] %v379_v52   ;;  %384 = vst [vmem:[%s2932_s27 + $0x1a8] sm:$0xff] %v383_v53   ;;  %v391_v55 = vld [vmem:[%s2927_s26 + $0x338] sm:$0xff]   ;;  %v395_v56 = vld [vmem:[%s2927_s26 + $0x380] sm:$0xff]  }
  0x2b   : > { %388 = vst [vmem:[%s2932_s27 + $0x1b0] sm:$0xff] %v387_v54   ;;  %392 = vst [vmem:[%s2932_s27 + $0x1b8] sm:$0xff] %v391_v55   ;;  %v399_v57 = vld [vmem:[%s2927_s26 + $0x388] sm:$0xff]   ;;  %v403_v58 = vld [vmem:[%s2927_s26 + $0x390] sm:$0xff]  }
  0x2c   : > { %396 = vst [vmem:[%s2932_s27 + $0x1c0] sm:$0xff] %v395_v56   ;;  %v407_v59 = vld [vmem:[%s2927_s26 + $0x398] sm:$0xff]   ;;  %400 = vst [vmem:[%s2932_s27 + $0x1c8] sm:$0xff] %v399_v57   ;;  %v411_v60 = vld [vmem:[%s2927_s26 + $0x3a0] sm:$0xff]  }
  0x2d   : > { %404 = vst [vmem:[%s2932_s27 + $0x1d0] sm:$0xff] %v403_v58   ;;  %408 = vst [vmem:[%s2932_s27 + $0x1d8] sm:$0xff] %v407_v59   ;;  %v415_v61 = vld [vmem:[%s2927_s26 + $0x3a8] sm:$0xff]   ;;  %v419_v62 = vld [vmem:[%s2927_s26 + $0x3b0] sm:$0xff]  }
  0x2e   : > { %412 = vst [vmem:[%s2932_s27 + $0x1e0] sm:$0xff] %v411_v60   ;;  %416 = vst [vmem:[%s2932_s27 + $0x1e8] sm:$0xff] %v415_v61   ;;  %v423_v63 = vld [vmem:[%s2927_s26 + $0x3b8] sm:$0xff]  }
  0x2f   : > { %420 = vst [vmem:[%s2932_s27 + $0x1f0] sm:$0xff] %v419_v62   ;;  %424 = vst [vmem:[%s2932_s27 + $0x1f8] sm:$0xff] %v423_v63  }
  0x30 PF: > { %p2366_p6 = scmp.ge.s32.totalorder %s2861_s16, 1  ;;  %p705_p7 = scmp.lt.s32.totalorder %s2861_s16, 3 }
  0x32   : > { %p706_p8 = pnand %p2366_p6, %p705_p7 }
  0x33   : > { %s712_s28 = sand.u32 (!%p706_p8), 1, %s2845_s12   ;;  %p2368_p9 = scmp.ne.s32.totalorder (!%p706_p8), %s2853_s14, 0 }
  0x34   : > { %709 = sbr.rel (%p706_p8) target bundleno = 436 (0x1b4), region = 69  ;;  %s2367_s29 = sshll.u32 (!%p706_p8), %s712_s28, 9 }
  0x35   : > { %s3062_s30 = scalar_lea.vmem (!%p706_p8), [#allocation3], %s2367_s29 }
  0x39   : > { %744 = sbr.rel (%p2368_p9) target bundleno = 64 (0x40), region = 77 }
  0x3e   : > { %v2863_v0 = vmov 0.0  }
  0x3f   : > { %745 = vst [vmem:[#allocation2] sm:$0xff] %v2863_v0 }
  0x40 PF: > { %v2756_v1 = vld [vmem:[%s3382_s1 + $0x10] ss:$0 sps:$4 sm:$0x33]   ;;  %vm1414_vm0 = vcmask 1041408   ;;  %v2757_v2 = vld [vmem:[%s3382_s1 + $0x8] sm:$0xff]   ;;  %vm1221_vm1 = vcmask 293888  }
  0x41   : > { %2713 = vmatprep.subr.msk.bf16.mxu0 %vm1414_vm0, %v2756_v1  ;;  %2714 = vmatprep.subr.msk.bf16.mxu1 %vm1414_vm0, %v2756_v1  ;;  %v1416_v3 = vsel %vm1414_vm0, %v2756_v1, 0  ;;  %v2758_v4 = vld [vmem:[%s3382_s1] sm:$0xff]   ;;  %v2759_v5 = vld [vmem:[%s3062_s30] sm:$0xff]   ;;  %v2761_v7 = vld [vmem:[%s3062_s30 + $0x8] sm:$0xff]   ;;  %vm2268_vm2 = vcmask 1041409   ;;  %vm2270_vm3 = vcmask 1042434  }
  0x42   : > { %2574 = vmatpush3.bf16.msra.mxu0 %v1416_v3  ;;  %2710 = vmatpush3.bf16.msra.mxu1 %v1416_v3  ;;  %v2760_v6 = vld [vmem:[%s3062_s30 + $0x100] sm:$0xff]   ;;  %v2762_v8 = vld [vmem:[%s3062_s30 + $0x108] sm:$0xff]   ;;  %v2763_v9 = vld [vmem:[%s3062_s30 + $0x10] sm:$0xff]   ;;  %vm2272_vm4 = vcmask 1043459   ;;  %vm2274_vm5 = vcmask 1044484   ;;  %vm2276_vm6 = vcmask 1045509  }
  0x43   : > { %2575 = vmatprep.subr.bf16.mxu0 %v2757_v2  ;;  %2708 = vmatprep.subr.bf16.mxu1 %v2757_v2  ;;  %v2764_v10 = vld [vmem:[%s3062_s30 + $0x110] sm:$0xff]   ;;  %v2765_v11 = vld [vmem:[%s3062_s30 + $0x18] sm:$0xff]   ;;  %v2767_v13 = vld [vmem:[%s3062_s30 + $0x20] sm:$0xff]   ;;  %vm2278_vm7 = vcmask 1046534   ;;  %vm2280_vm8 = vcmask 1047559   ;;  %p2501_p10 = scmp.ne.s32.totalorder %s2853_s14, 1 }
  0x44   : > { %2579 = vmatprep.mubr.msk.bf16.mxu0 %vm1221_vm1, %v2759_v5  ;;  %2643 = vmatprep.mubr.msk.bf16.mxu1 %vm1221_vm1, %v2760_v6  ;;  %v2766_v12 = vld [vmem:[%s3062_s30 + $0x118] sm:$0xff]   ;;  %v2768_v14 = vld [vmem:[%s3062_s30 + $0x120] sm:$0xff]   ;;  %v2769_v15 = vld [vmem:[%s3062_s30 + $0x28] sm:$0xff]  }
  0x45   : > { %v2770_v16 = vld [vmem:[%s3062_s30 + $0x128] sm:$0xff]   ;;  %v2771_v17 = vld [vmem:[%s3062_s30 + $0x30] sm:$0xff]   ;;  %v2773_v19 = vld [vmem:[%s3062_s30 + $0x38] sm:$0xff]  }
  0x46   : > { %2576 = vmatpush3.bf16.msra.mxu0 %v2757_v2  ;;  %2711 = vmatpush3.bf16.msra.mxu1 %v2757_v2  ;;  %v2772_v18 = vld [vmem:[%s3062_s30 + $0x130] sm:$0xff]   ;;  %v2774_v20 = vld [vmem:[%s3062_s30 + $0x138] sm:$0xff]   ;;  %v2775_v21 = vld [vmem:[%s3062_s30 + $0x40] sm:$0xff]  }
  0x47   : > { %2577 = vmatprep.subr.bf16.mxu0 %v2758_v4  ;;  %2709 = vmatprep.subr.bf16.mxu1 %v2758_v4  ;;  %v2776_v22 = vld [vmem:[%s3062_s30 + $0x140] sm:$0xff]   ;;  %v2777_v23 = vld [vmem:[%s3062_s30 + $0x48] sm:$0xff]   ;;  %v2779_v25 = vld [vmem:[%s3062_s30 + $0x50] sm:$0xff]  }
  0x48   : > { %v2778_v24 = vld [vmem:[%s3062_s30 + $0x148] sm:$0xff]   ;;  %v2780_v26 = vld [vmem:[%s3062_s30 + $0x150] sm:$0xff]   ;;  %v2781_v27 = vld [vmem:[%s3062_s30 + $0x58] sm:$0xff]  }
  0x49   : > { %v2782_v28 = vld [vmem:[%s3062_s30 + $0x158] sm:$0xff]   ;;  %v2783_v29 = vld [vmem:[%s3062_s30 + $0x60] sm:$0xff]   ;;  %v2785_v31 = vld [vmem:[%s3062_s30 + $0x68] sm:$0xff]  }
  0x4a   : > { %2578 = vmatpush3.bf16.msra.mxu0 %v2758_v4  ;;  %2712 = vmatpush3.bf16.msra.mxu1 %v2758_v4  ;;  %v2784_v30 = vld [vmem:[%s3062_s30 + $0x160] sm:$0xff]   ;;  %v2786_v32 = vld [vmem:[%s3062_s30 + $0x168] sm:$0xff]   ;;  %v2787_v33 = vld [vmem:[%s3062_s30 + $0x70] sm:$0xff]  }
  0x4b   : > { %v2788_v34 = vld [vmem:[%s3062_s30 + $0x170] sm:$0xff]   ;;  %v2789_v35 = vld [vmem:[%s3062_s30 + $0x78] sm:$0xff]   ;;  %v2791_v37 = vld [vmem:[%s3062_s30 + $0x80] sm:$0xff]  }
  0x4c   : > { %v2790_v36 = vld [vmem:[%s3062_s30 + $0x178] sm:$0xff]   ;;  %v2792_v38 = vld [vmem:[%s3062_s30 + $0x180] sm:$0xff]   ;;  %v2793_v39 = vld [vmem:[%s3062_s30 + $0x88] sm:$0xff]  }
  0x4d   : > { %2580 = vmatmul.mubr.msk.bf16.vlgmr.msra.gmra.mxu0 %vm1221_vm1, %v2761_v7  ;;  %2644 = vmatmul.mubr.msk.bf16.vlgmr.msra.gmra.mxu1 %vm1221_vm1, %v2762_v8  ;;  %v2794_v40 = vld [vmem:[%s3062_s30 + $0x188] sm:$0xff]   ;;  %v2795_v41 = vld [vmem:[%s3062_s30 + $0x90] sm:$0xff]   ;;  %v2797_v43 = vld [vmem:[%s3062_s30 + $0x98] sm:$0xff]  }
  0x4e   : > { %2583 = vmatprep.mubr.msk.bf16.mxu0 %vm1221_vm1, %v2763_v9  ;;  %2647 = vmatprep.mubr.msk.bf16.mxu1 %vm1221_vm1, %v2764_v10  ;;  %v2796_v42 = vld [vmem:[%s3062_s30 + $0x190] sm:$0xff]   ;;  %v2798_v44 = vld [vmem:[%s3062_s30 + $0x198] sm:$0xff]   ;;  %v2799_v45 = vld [vmem:[%s3062_s30 + $0xa0] sm:$0xff]  }
  0x4f   : > { %v2800_v46 = vld [vmem:[%s3062_s30 + $0x1a0] sm:$0xff]   ;;  %v2801_v47 = vld [vmem:[%s3062_s30 + $0xa8] sm:$0xff]   ;;  %v2803_v49 = vld [vmem:[%s3062_s30 + $0xb0] sm:$0xff]  }
  0x50   : > { %v2802_v48 = vld [vmem:[%s3062_s30 + $0x1a8] sm:$0xff]   ;;  %v2804_v50 = vld [vmem:[%s3062_s30 + $0x1b0] sm:$0xff]   ;;  %v2805_v51 = vld [vmem:[%s3062_s30 + $0xb8] sm:$0xff]  }
  0x51   : > { %v2806_v52 = vld [vmem:[%s3062_s30 + $0x1b8] sm:$0xff]   ;;  %v2807_v53 = vld [vmem:[%s3062_s30 + $0xc0] sm:$0xff]   ;;  %v2809_v55 = vld [vmem:[%s3062_s30 + $0xc8] sm:$0xff]  }
  0x52   : > { %v2808_v54 = vld [vmem:[%s3062_s30 + $0x1c0] sm:$0xff]   ;;  %v2810_v56 = vld [vmem:[%s3062_s30 + $0x1c8] sm:$0xff]   ;;  %v2811_v57 = vld [vmem:[%s3062_s30 + $0xd0] sm:$0xff]  }
  0x53   : > { %v2812_v58 = vld [vmem:[%s3062_s30 + $0x1d0] sm:$0xff]   ;;  %v2813_v59 = vld [vmem:[%s3062_s30 + $0xd8] sm:$0xff]   ;;  %v2815_v61 = vld [vmem:[%s3062_s30 + $0xe0] sm:$0xff]  }
  0x54   : > { %v2814_v60 = vld [vmem:[%s3062_s30 + $0x1d8] sm:$0xff]   ;;  %v2816_v62 = vld [vmem:[%s3062_s30 + $0x1e0] sm:$0xff]   ;;  %v2817_v63 = vld [vmem:[%s3062_s30 + $0xe8] sm:$0xff]  }
  0x55   : > { %2584 = vmatmul.mubr.msk.bf16.gmra.mxu0 %vm1221_vm1, %v2765_v11  ;;  %2648 = vmatmul.mubr.msk.bf16.gmra.mxu1 %vm1221_vm1, %v2766_v12  ;;  %v2818_v0 = vld [vmem:[%s3062_s30 + $0x1e8] sm:$0xff]   ;;  %v2819_v1 = vld [vmem:[%s3062_s30 + $0xf0] sm:$0xff]   ;;  %v2821_v3 = vld [vmem:[%s3062_s30 + $0xf8] sm:$0xff]  }
  0x56   : > { %2587 = vmatprep.mubr.msk.bf16.mxu0 %vm1221_vm1, %v2767_v13  ;;  %2651 = vmatprep.mubr.msk.bf16.mxu1 %vm1221_vm1, %v2768_v14  ;;  %v2820_v2 = vld [vmem:[%s3062_s30 + $0x1f0] sm:$0xff]   ;;  %v2822_v4 = vld [vmem:[%s3062_s30 + $0x1f8] sm:$0xff]  }
  0x57   : > { %v3205_v9 = vld [vmem:[%s3383_s2] ss:$0 sm:$0xff] }
  0x5d   : > { %2588 = vmatmul.mubr.msk.bf16.gmra.mxu0 %vm1221_vm1, %v2769_v15  ;;  %2652 = vmatmul.mubr.msk.bf16.gmra.mxu1 %vm1221_vm1, %v2770_v16 }
  0x5e   : > { %2591 = vmatprep.mubr.msk.bf16.mxu0 %vm1221_vm1, %v2771_v17  ;;  %2655 = vmatprep.mubr.msk.bf16.mxu1 %vm1221_vm1, %v2772_v18 }
  0x65   : > { %2592 = vmatmul.mubr.msk.bf16.gmra.mxu0 %vm1221_vm1, %v2773_v19  ;;  %2656 = vmatmul.mubr.msk.bf16.gmra.mxu1 %vm1221_vm1, %v2774_v20 }
  0x66   : > { %2595 = vmatprep.mubr.msk.bf16.mxu0 %vm1221_vm1, %v2775_v21  ;;  %2659 = vmatprep.mubr.msk.bf16.mxu1 %vm1221_vm1, %v2776_v22 }
  0x6d   : > { %2596 = vmatmul.mubr.msk.bf16.gmra.mxu0 %vm1221_vm1, %v2777_v23  ;;  %2660 = vmatmul.mubr.msk.bf16.gmra.mxu1 %vm1221_vm1, %v2778_v24 }
  0x6e   : > { %2599 = vmatprep.mubr.msk.bf16.mxu0 %vm1221_vm1, %v2779_v25  ;;  %2663 = vmatprep.mubr.msk.bf16.mxu1 %vm1221_vm1, %v2780_v26 }
  0x75   : > { %2600 = vmatmul.mubr.msk.bf16.gmra.mxu0 %vm1221_vm1, %v2781_v27  ;;  %2664 = vmatmul.mubr.msk.bf16.gmra.mxu1 %vm1221_vm1, %v2782_v28 }
  0x76   : > { %2603 = vmatprep.mubr.msk.bf16.mxu0 %vm1221_vm1, %v2783_v29  ;;  %2667 = vmatprep.mubr.msk.bf16.mxu1 %vm1221_vm1, %v2784_v30 }
  0x7d   : > { %2604 = vmatmul.mubr.msk.bf16.gmra.mxu0 %vm1221_vm1, %v2785_v31  ;;  %2668 = vmatmul.mubr.msk.bf16.gmra.mxu1 %vm1221_vm1, %v2786_v32 }
  0x7e   : > { %2607 = vmatprep.mubr.msk.bf16.mxu0 %vm1221_vm1, %v2787_v33  ;;  %2671 = vmatprep.mubr.msk.bf16.mxu1 %vm1221_vm1, %v2788_v34 }
  0x85   : > { %2608 = vmatmul.mubr.msk.bf16.gmra.mxu0 %vm1221_vm1, %v2789_v35  ;;  %2672 = vmatmul.mubr.msk.bf16.gmra.mxu1 %vm1221_vm1, %v2790_v36 }
  0x86   : > { %2611 = vmatprep.mubr.msk.bf16.mxu0 %vm1221_vm1, %v2791_v37  ;;  %2675 = vmatprep.mubr.msk.bf16.mxu1 %vm1221_vm1, %v2792_v38 }
  0x8d   : > { %2612 = vmatmul.mubr.msk.bf16.gmra.mxu0 %vm1221_vm1, %v2793_v39  ;;  %2676 = vmatmul.mubr.msk.bf16.gmra.mxu1 %vm1221_vm1, %v2794_v40 }
  0x8e   : > { %2615 = vmatprep.mubr.msk.bf16.mxu0 %vm1221_vm1, %v2795_v41  ;;  %2679 = vmatprep.mubr.msk.bf16.mxu1 %vm1221_vm1, %v2796_v42 }
  0x95   : > { %2616 = vmatmul.mubr.msk.bf16.gmra.mxu0 %vm1221_vm1, %v2797_v43  ;;  %2680 = vmatmul.mubr.msk.bf16.gmra.mxu1 %vm1221_vm1, %v2798_v44 }
  0x96   : > { %2619 = vmatprep.mubr.msk.bf16.mxu0 %vm1221_vm1, %v2799_v45  ;;  %2683 = vmatprep.mubr.msk.bf16.mxu1 %vm1221_vm1, %v2800_v46 }
  0x9d   : > { %2620 = vmatmul.mubr.msk.bf16.gmra.mxu0 %vm1221_vm1, %v2801_v47  ;;  %2684 = vmatmul.mubr.msk.bf16.gmra.mxu1 %vm1221_vm1, %v2802_v48 }
  0x9e   : > { %2623 = vmatprep.mubr.msk.bf16.mxu0 %vm1221_vm1, %v2803_v49  ;;  %2687 = vmatprep.mubr.msk.bf16.mxu1 %vm1221_vm1, %v2804_v50 }
  0xa5   : > { %2624 = vmatmul.mubr.msk.bf16.gmra.mxu0 %vm1221_vm1, %v2805_v51  ;;  %2688 = vmatmul.mubr.msk.bf16.gmra.mxu1 %vm1221_vm1, %v2806_v52 }
  0xa6   : > { %2627 = vmatprep.mubr.msk.bf16.mxu0 %vm1221_vm1, %v2807_v53  ;;  %2691 = vmatprep.mubr.msk.bf16.mxu1 %vm1221_vm1, %v2808_v54 }
  0xad   : > { %2628 = vmatmul.mubr.msk.bf16.gmra.mxu0 %vm1221_vm1, %v2809_v55  ;;  %2692 = vmatmul.mubr.msk.bf16.gmra.mxu1 %vm1221_vm1, %v2810_v56 }
  0xae   : > { %2631 = vmatprep.mubr.msk.bf16.mxu0 %vm1221_vm1, %v2811_v57  ;;  %2695 = vmatprep.mubr.msk.bf16.mxu1 %vm1221_vm1, %v2812_v58 }
  0xb5   : > { %2632 = vmatmul.mubr.msk.bf16.gmra.mxu0 %vm1221_vm1, %v2813_v59  ;;  %2696 = vmatmul.mubr.msk.bf16.gmra.mxu1 %vm1221_vm1, %v2814_v60 }
  0xb6   : > { %2635 = vmatprep.mubr.msk.bf16.mxu0 %vm1221_vm1, %v2815_v61  ;;  %2699 = vmatprep.mubr.msk.bf16.mxu1 %vm1221_vm1, %v2816_v62 }
  0xbd   : > { %2636 = vmatmul.mubr.msk.bf16.gmra.mxu0 %vm1221_vm1, %v2817_v63  ;;  %2700 = vmatmul.mubr.msk.bf16.gmra.mxu1 %vm1221_vm1, %v2818_v0 }
  0xbe   : > { %2639 = vmatprep.mubr.msk.bf16.mxu0 %vm1221_vm1, %v2819_v1  ;;  %2703 = vmatprep.mubr.msk.bf16.mxu1 %vm1221_vm1, %v2820_v2 }
  0xc5   : > { %2640 = vmatmul.mubr.msk.bf16.gmra.mxu0 %vm1221_vm1, %v2821_v3  ;;  %2704 = vmatmul.mubr.msk.bf16.gmra.mxu1 %vm1221_vm1, %v2822_v4 }
 0x10d   : > { %v2581_v5 = vpop.f32.mrf.mxu0  ;;  %v2645_v6 = vpop.f32.mrf.mxu1 }
 0x10e   : > { %v1461_v16 = vadd.f32 %v2581_v5, %v3205_v9  ;;  %v1717_v17 = vadd.f32 %v2645_v6, %v3205_v9 }
 0x10f   : > { %v1452_v7 = vpop.f32.mrf.mxu0  ;;  %v1708_v8 = vpop.f32.mrf.mxu1 }
 0x110   : > { %v1453_v10 = vadd.f32 %v3205_v9, %v1452_v7  ;;  %v1709_v11 = vadd.f32 %v3205_v9, %v1708_v8  ;;  %v1965_v30 = vmax.f32 %v1461_v16, 0.0  ;;  %v2029_v31 = vmax.f32 %v1717_v17, 0.0 }
 0x111   : > { %v2582_v12 = vpop.f32.mrf.mxu0  ;;  %v2646_v13 = vpop.f32.mrf.mxu1 }
 0x112   : > { %v1963_v20 = vmax.f32 %v1453_v10, 0.0  ;;  %v2027_v21 = vmax.f32 %v1709_v11, 0.0  ;;  %v1464_v24 = vadd.f32 %v2582_v12, %v3205_v9  ;;  %v1720_v25 = vadd.f32 %v2646_v13, %v3205_v9 }
 0x113   : > { %v1455_v14 = vpop.f32.mrf.mxu0  ;;  %v1711_v15 = vpop.f32.mrf.mxu1 }
 0x114   : > { %v1456_v18 = vadd.f32 %v3205_v9, %v1455_v14  ;;  %v1712_v19 = vadd.f32 %v3205_v9, %v1711_v15  ;;  %v1966_v38 = vmax.f32 %v1464_v24, 0.0  ;;  %v2030_v39 = vmax.f32 %v1720_v25, 0.0 }
 0x115   : > { %v2585_v22 = vpop.f32.mrf.mxu0  ;;  %v2649_v23 = vpop.f32.mrf.mxu1 }
 0x116   : > { %v1964_v26 = vmax.f32 %v1456_v18, 0.0  ;;  %v2028_v27 = vmax.f32 %v1712_v19, 0.0  ;;  %v1477_v45 = vadd.f32 %v2585_v22, %v3205_v9  ;;  %v1733_v49 = vadd.f32 %v2649_v23, %v3205_v9 }
 0x117   : > { %v1468_v28 = vpop.f32.mrf.mxu0  ;;  %v1724_v29 = vpop.f32.mrf.mxu1 }
 0x118   : > { %v2092_v32 = vadd.f32 %v1964_v26, %v1963_v20  ;;  %v2176_v33 = vadd.f32 %v2028_v27, %v2027_v21  ;;  %v1469_v34 = vadd.f32 %v3205_v9, %v1468_v28  ;;  %v1725_v35 = vadd.f32 %v3205_v9, %v1724_v29 }
 0x119   : > { %v2586_v36 = vpop.f32.mrf.mxu0  ;;  %v2650_v37 = vpop.f32.mrf.mxu1  ;;  %v1969_v62 = vmax.f32 %v1477_v45, 0.0  ;;  %v2033_v0 = vmax.f32 %v1733_v49, 0.0 }
 0x11a   : > { %v2093_v40 = vadd.f32 %v2092_v32, %v1965_v30  ;;  %v2177_v41 = vadd.f32 %v2176_v33, %v2029_v31  ;;  %v2031_v42 = vmax.f32 %v1725_v35, 0.0  ;;  %v1967_v46 = vmax.f32 %v1469_v34, 0.0 }
 0x11b   : > { %v1471_v43 = vpop.f32.mrf.mxu0  ;;  %v1727_v44 = vpop.f32.mrf.mxu1  ;;  %v1480_v56 = vadd.f32 %v2586_v36, %v3205_v9  ;;  %v1736_v57 = vadd.f32 %v2650_v37, %v3205_v9 }
 0x11c   : > { %v2094_v47 = vadd.f32 %v2093_v40, %v1966_v38  ;;  %v2178_v48 = vadd.f32 %v2177_v41, %v2030_v39  ;;  %v1472_v50 = vadd.f32 %v3205_v9, %v1471_v43  ;;  %v1728_v51 = vadd.f32 %v3205_v9, %v1727_v44 }
 0x11d   : > { %v2589_v52 = vpop.f32.mrf.mxu0  ;;  %v2653_v53 = vpop.f32.mrf.mxu1  ;;  %v1970_v6 = vmax.f32 %v1480_v56, 0.0  ;;  %v2034_v7 = vmax.f32 %v1736_v57, 0.0 }
 0x11e   : > { %v2095_v54 = vadd.f32 %v2094_v47, %v1967_v46  ;;  %v2179_v55 = vadd.f32 %v2178_v48, %v2031_v42  ;;  %v1968_v58 = vmax.f32 %v1472_v50, 0.0  ;;  %v2032_v59 = vmax.f32 %v1728_v51, 0.0 }
 0x11f   : > { %v1484_v60 = vpop.f32.mrf.mxu0  ;;  %v1740_v61 = vpop.f32.mrf.mxu1  ;;  %v1493_v14 = vadd.f32 %v2589_v52, %v3205_v9  ;;  %v1749_v17 = vadd.f32 %v2653_v53, %v3205_v9 }
 0x120   : > { %v1741_v63 = vadd.f32 %v3205_v9, %v1740_v61  ;;  %v2096_v1 = vadd.f32 %v2095_v54, %v1968_v58  ;;  %v2180_v2 = vadd.f32 %v2179_v55, %v2032_v59  ;;  %v1485_v3 = vadd.f32 %v3205_v9, %v1484_v60 }
 0x121   : > { %v2590_v4 = vpop.f32.mrf.mxu0  ;;  %v2654_v5 = vpop.f32.mrf.mxu1  ;;  %v1973_v31 = vmax.f32 %v1493_v14, 0.0  ;;  %v2037_v33 = vmax.f32 %v1749_v17, 0.0 }
 0x122   : > { %v2097_v8 = vadd.f32 %v2096_v1, %v1969_v62  ;;  %v2181_v10 = vadd.f32 %v2180_v2, %v2033_v0  ;;  %v2035_v11 = vmax.f32 %v1741_v63, 0.0  ;;  %v1971_v18 = vmax.f32 %v1485_v3, 0.0 }
 0x123   : > { %v1487_v12 = vpop.f32.mrf.mxu0  ;;  %v1743_v13 = vpop.f32.mrf.mxu1  ;;  %v1496_v23 = vadd.f32 %v2590_v4, %v3205_v9  ;;  %v1752_v28 = vadd.f32 %v2654_v5, %v3205_v9 }
 0x124   : > { %v1488_v15 = vadd.f32 %v3205_v9, %v1487_v12  ;;  %v1744_v16 = vadd.f32 %v3205_v9, %v1743_v13  ;;  %v2098_v19 = vadd.f32 %v2097_v8, %v1970_v6  ;;  %v2182_v20 = vadd.f32 %v2181_v10, %v2034_v7 }
 0x125   : > { %v2593_v21 = vpop.f32.mrf.mxu0  ;;  %v2657_v22 = vpop.f32.mrf.mxu1  ;;  %v1974_v39 = vmax.f32 %v1496_v23, 0.0  ;;  %v2038_v40 = vmax.f32 %v1752_v28, 0.0 }
 0x126   : > { %v1972_v24 = vmax.f32 %v1488_v15, 0.0  ;;  %v2036_v25 = vmax.f32 %v1744_v16, 0.0  ;;  %v2099_v26 = vadd.f32 %v2098_v19, %v1971_v18  ;;  %v2183_v27 = vadd.f32 %v2182_v20, %v2035_v11 }
 0x127   : > { %v1500_v29 = vpop.f32.mrf.mxu0  ;;  %v1756_v30 = vpop.f32.mrf.mxu1  ;;  %v1509_v46 = vadd.f32 %v2593_v21, %v3205_v9  ;;  %v1765_v47 = vadd.f32 %v2657_v22, %v3205_v9 }
 0x128   : > { %v1757_v32 = vadd.f32 %v3205_v9, %v1756_v30  ;;  %v2100_v34 = vadd.f32 %v2099_v26, %v1972_v24  ;;  %v2184_v35 = vadd.f32 %v2183_v27, %v2036_v25  ;;  %v1501_v36 = vadd.f32 %v3205_v9, %v1500_v29 }
 0x129   : > { %v2594_v37 = vpop.f32.mrf.mxu0  ;;  %v2658_v38 = vpop.f32.mrf.mxu1  ;;  %v1977_v63 = vmax.f32 %v1509_v46, 0.0  ;;  %v2041_v0 = vmax.f32 %v1765_v47, 0.0 }
 0x12a   : > { %v2101_v41 = vadd.f32 %v2100_v34, %v1973_v31  ;;  %v2185_v42 = vadd.f32 %v2184_v35, %v2037_v33  ;;  %v2039_v43 = vmax.f32 %v1757_v32, 0.0  ;;  %v1975_v50 = vmax.f32 %v1501_v36, 0.0 }
 0x12b   : > { %v1503_v44 = vpop.f32.mrf.mxu0  ;;  %v1759_v45 = vpop.f32.mrf.mxu1  ;;  %v1512_v59 = vadd.f32 %v2594_v37, %v3205_v9  ;;  %v1768_v60 = vadd.f32 %v2658_v38, %v3205_v9 }
 0x12c   : > { %v1504_v48 = vadd.f32 %v3205_v9, %v1503_v44  ;;  %v1760_v49 = vadd.f32 %v3205_v9, %v1759_v45  ;;  %v2102_v51 = vadd.f32 %v2101_v41, %v1974_v39  ;;  %v2186_v52 = vadd.f32 %v2185_v42, %v2038_v40 }
 0x12d   : > { %v2597_v53 = vpop.f32.mrf.mxu0  ;;  %v2661_v54 = vpop.f32.mrf.mxu1  ;;  %v1978_v7 = vmax.f32 %v1512_v59, 0.0  ;;  %v2042_v8 = vmax.f32 %v1768_v60, 0.0 }
 0x12e   : > { %v1976_v55 = vmax.f32 %v1504_v48, 0.0  ;;  %v2040_v56 = vmax.f32 %v1760_v49, 0.0  ;;  %v2103_v57 = vadd.f32 %v2102_v51, %v1975_v50  ;;  %v2187_v58 = vadd.f32 %v2186_v52, %v2039_v43 }
 0x12f   : > { %v1516_v61 = vpop.f32.mrf.mxu0  ;;  %v1772_v62 = vpop.f32.mrf.mxu1  ;;  %v1525_v14 = vadd.f32 %v2597_v53, %v3205_v9  ;;  %v1781_v15 = vadd.f32 %v2661_v54, %v3205_v9 }
 0x130   : > { %v2104_v1 = vadd.f32 %v2103_v57, %v1976_v55  ;;  %v2188_v2 = vadd.f32 %v2187_v58, %v2040_v56  ;;  %v1517_v3 = vadd.f32 %v3205_v9, %v1516_v61  ;;  %v1773_v4 = vadd.f32 %v3205_v9, %v1772_v62 }
 0x131   : > { %v2598_v5 = vpop.f32.mrf.mxu0  ;;  %v2662_v6 = vpop.f32.mrf.mxu1  ;;  %v1981_v30 = vmax.f32 %v1525_v14, 0.0  ;;  %v2045_v31 = vmax.f32 %v1781_v15, 0.0 }
 0x132   : > { %v2105_v10 = vadd.f32 %v2104_v1, %v1977_v63  ;;  %v2189_v11 = vadd.f32 %v2188_v2, %v2041_v0  ;;  %v1979_v20 = vmax.f32 %v1517_v3, 0.0  ;;  %v2043_v21 = vmax.f32 %v1773_v4, 0.0 }
 0x133   : > { %v1519_v12 = vpop.f32.mrf.mxu0  ;;  %v1775_v13 = vpop.f32.mrf.mxu1  ;;  %v1528_v24 = vadd.f32 %v2598_v5, %v3205_v9  ;;  %v1784_v25 = vadd.f32 %v2662_v6, %v3205_v9 }
 0x134   : > { %v1520_v16 = vadd.f32 %v3205_v9, %v1519_v12  ;;  %v1776_v17 = vadd.f32 %v3205_v9, %v1775_v13  ;;  %v3245_v18 = vadd.f32 %v2105_v10, %v1978_v7  ;;  %v3247_v19 = vadd.f32 %v2189_v11, %v2042_v8 }
 0x135   : > { %v2601_v22 = vpop.f32.mrf.mxu0  ;;  %v2665_v23 = vpop.f32.mrf.mxu1  ;;  %v1982_v38 = vmax.f32 %v1528_v24, 0.0  ;;  %v2046_v39 = vmax.f32 %v1784_v25, 0.0 }
 0x136   : > { %v1980_v26 = vmax.f32 %v1520_v16, 0.0  ;;  %v2044_v27 = vmax.f32 %v1776_v17, 0.0  ;;  %v1541_v45 = vadd.f32 %v2601_v22, %v3205_v9  ;;  %v1797_v49 = vadd.f32 %v2665_v23, %v3205_v9 }
 0x137   : > { %v1532_v28 = vpop.f32.mrf.mxu0  ;;  %v1788_v29 = vpop.f32.mrf.mxu1 }
 0x138   : > { %v2113_v32 = vadd.f32 %v1980_v26, %v1979_v20  ;;  %v2197_v33 = vadd.f32 %v2044_v27, %v2043_v21  ;;  %v1533_v34 = vadd.f32 %v3205_v9, %v1532_v28  ;;  %v1789_v35 = vadd.f32 %v3205_v9, %v1788_v29 }
 0x139   : > { %v2602_v36 = vpop.f32.mrf.mxu0  ;;  %v2666_v37 = vpop.f32.mrf.mxu1  ;;  %v1985_v62 = vmax.f32 %v1541_v45, 0.0  ;;  %v2049_v0 = vmax.f32 %v1797_v49, 0.0 }
 0x13a   : > { %v2114_v40 = vadd.f32 %v2113_v32, %v1981_v30  ;;  %v2198_v41 = vadd.f32 %v2197_v33, %v2045_v31  ;;  %v2047_v42 = vmax.f32 %v1789_v35, 0.0  ;;  %v1983_v46 = vmax.f32 %v1533_v34, 0.0 }
 0x13b   : > { %v1535_v43 = vpop.f32.mrf.mxu0  ;;  %v1791_v44 = vpop.f32.mrf.mxu1  ;;  %v1544_v56 = vadd.f32 %v2602_v36, %v3205_v9  ;;  %v1800_v57 = vadd.f32 %v2666_v37, %v3205_v9 }
 0x13c   : > { %v2115_v47 = vadd.f32 %v2114_v40, %v1982_v38  ;;  %v2199_v48 = vadd.f32 %v2198_v41, %v2046_v39  ;;  %v1536_v50 = vadd.f32 %v3205_v9, %v1535_v43  ;;  %v1792_v51 = vadd.f32 %v3205_v9, %v1791_v44 }
 0x13d   : > { %v2605_v52 = vpop.f32.mrf.mxu0  ;;  %v2669_v53 = vpop.f32.mrf.mxu1  ;;  %v1986_v6 = vmax.f32 %v1544_v56, 0.0  ;;  %v2050_v7 = vmax.f32 %v1800_v57, 0.0  ;;  %v2107_v41 = vrot.slane %v3245_v18, 4 }
 0x13e   : > { %v2116_v54 = vadd.f32 %v2115_v47, %v1983_v46  ;;  %v2200_v55 = vadd.f32 %v2199_v48, %v2047_v42  ;;  %v1984_v58 = vmax.f32 %v1536_v50, 0.0  ;;  %v2048_v59 = vmax.f32 %v1792_v51, 0.0 }
 0x13f   : > { %v1548_v60 = vpop.f32.mrf.mxu0  ;;  %v1804_v61 = vpop.f32.mrf.mxu1  ;;  %v1557_v14 = vadd.f32 %v2605_v52, %v3205_v9  ;;  %v1813_v17 = vadd.f32 %v2669_v53, %v3205_v9 }
 0x140   : > { %v1805_v63 = vadd.f32 %v3205_v9, %v1804_v61  ;;  %v2117_v1 = vadd.f32 %v2116_v54, %v1984_v58  ;;  %v2201_v2 = vadd.f32 %v2200_v55, %v2048_v59  ;;  %v1549_v3 = vadd.f32 %v3205_v9, %v1548_v60 }
 0x141   : > { %v2606_v4 = vpop.f32.mrf.mxu0  ;;  %v2670_v5 = vpop.f32.mrf.mxu1  ;;  %v1989_v33 = vmax.f32 %v1557_v14, 0.0  ;;  %v2053_v35 = vmax.f32 %v1813_v17, 0.0  ;;  %v2108_v58 = vadd.f32 %v2107_v41, %v3245_v18 }
 0x142   : > { %v2118_v8 = vadd.f32 %v2117_v1, %v1985_v62  ;;  %v2202_v10 = vadd.f32 %v2201_v2, %v2049_v0  ;;  %v2051_v11 = vmax.f32 %v1805_v63, 0.0  ;;  %v1987_v20 = vmax.f32 %v1549_v3, 0.0 }
 0x143   : > { %v1551_v12 = vpop.f32.mrf.mxu0  ;;  %v1807_v13 = vpop.f32.mrf.mxu1  ;;  %v1560_v25 = vadd.f32 %v2606_v4, %v3205_v9  ;;  %v1816_v30 = vadd.f32 %v2670_v5, %v3205_v9 }
 0x144   : > { %v1552_v15 = vadd.f32 %v3205_v9, %v1551_v12  ;;  %v1808_v16 = vadd.f32 %v3205_v9, %v1807_v13  ;;  %v2119_v21 = vadd.f32 %v2118_v8, %v1986_v6  ;;  %v2203_v22 = vadd.f32 %v2202_v10, %v2050_v7 }
 0x145   : > { %v2609_v23 = vpop.f32.mrf.mxu0  ;;  %v2673_v24 = vpop.f32.mrf.mxu1  ;;  %v1990_v42 = vmax.f32 %v1560_v25, 0.0  ;;  %v2054_v43 = vmax.f32 %v1816_v30, 0.0 }
 0x146   : > { %v1988_v26 = vmax.f32 %v1552_v15, 0.0  ;;  %v2052_v27 = vmax.f32 %v1808_v16, 0.0  ;;  %v2120_v28 = vadd.f32 %v2119_v21, %v1987_v20  ;;  %v2204_v29 = vadd.f32 %v2203_v22, %v2051_v11 }
 0x147   : > { %v1564_v31 = vpop.f32.mrf.mxu0  ;;  %v1820_v32 = vpop.f32.mrf.mxu1  ;;  %v1573_v49 = vadd.f32 %v2609_v23, %v3205_v9  ;;  %v1829_v50 = vadd.f32 %v2673_v24, %v3205_v9  ;;  %v2109_v11 = vrot.slane %v2108_v58, 2 }
 0x148   : > { %v1821_v34 = vadd.f32 %v3205_v9, %v1820_v32  ;;  %v2121_v36 = vadd.f32 %v2120_v28, %v1988_v26  ;;  %v2205_v37 = vadd.f32 %v2204_v29, %v2052_v27  ;;  %v1565_v38 = vadd.f32 %v3205_v9, %v1564_v31 }
 0x149   : > { %v2610_v39 = vpop.f32.mrf.mxu0  ;;  %v2674_v40 = vpop.f32.mrf.mxu1  ;;  %v1993_v3 = vmax.f32 %v1573_v49, 0.0  ;;  %v2057_v4 = vmax.f32 %v1829_v50, 0.0 }
 0x14a   : > { %v2122_v44 = vadd.f32 %v2121_v36, %v1989_v33  ;;  %v2206_v45 = vadd.f32 %v2205_v37, %v2053_v35  ;;  %v2055_v46 = vmax.f32 %v1821_v34, 0.0  ;;  %v1991_v53 = vmax.f32 %v1565_v38, 0.0 }
 0x14b   : > { %v1567_v47 = vpop.f32.mrf.mxu0  ;;  %v1823_v48 = vpop.f32.mrf.mxu1  ;;  %v1576_v63 = vadd.f32 %v2610_v39, %v3205_v9  ;;  %v1832_v0 = vadd.f32 %v2674_v40, %v3205_v9  ;;  %v2110_v34 = vadd.f32 %v2109_v11, %v2108_v58 }
 0x14c   : > { %v1568_v51 = vadd.f32 %v3205_v9, %v1567_v47  ;;  %v1824_v52 = vadd.f32 %v3205_v9, %v1823_v48  ;;  %v2123_v54 = vadd.f32 %v2122_v44, %v1990_v42  ;;  %v2207_v55 = vadd.f32 %v2206_v45, %v2054_v43 }
 0x14d   : > { %v2613_v56 = vpop.f32.mrf.mxu0  ;;  %v2677_v57 = vpop.f32.mrf.mxu1  ;;  %v1994_v12 = vmax.f32 %v1576_v63, 0.0  ;;  %v2058_v13 = vmax.f32 %v1832_v0, 0.0 }
 0x14e   : > { %v1992_v59 = vmax.f32 %v1568_v51, 0.0  ;;  %v2056_v60 = vmax.f32 %v1824_v52, 0.0  ;;  %v2124_v61 = vadd.f32 %v2123_v54, %v1991_v53  ;;  %v2208_v62 = vadd.f32 %v2207_v55, %v2055_v46 }
 0x14f   : > { %v1580_v1 = vpop.f32.mrf.mxu0  ;;  %v1836_v2 = vpop.f32.mrf.mxu1  ;;  %v1589_v20 = vadd.f32 %v2613_v56, %v3205_v9  ;;  %v1845_v21 = vadd.f32 %v2677_v57, %v3205_v9  ;;  %v2111_v55 = vrot.slane %v2110_v34, 1 }
 0x150   : > { %v2125_v5 = vadd.f32 %v2124_v61, %v1992_v59  ;;  %v2209_v6 = vadd.f32 %v2208_v62, %v2056_v60  ;;  %v1581_v7 = vadd.f32 %v3205_v9, %v1580_v1  ;;  %v1837_v8 = vadd.f32 %v3205_v9, %v1836_v2 }
 0x151   : > { %v2614_v10 = vpop.f32.mrf.mxu0  ;;  %v2678_v18 = vpop.f32.mrf.mxu1  ;;  %v1997_v38 = vmax.f32 %v1589_v20, 0.0  ;;  %v2061_v39 = vmax.f32 %v1845_v21, 0.0 }
 0x152   : > { %v2126_v14 = vadd.f32 %v2125_v5, %v1993_v3  ;;  %v2210_v15 = vadd.f32 %v2209_v6, %v2057_v4  ;;  %v1995_v26 = vmax.f32 %v1581_v7, 0.0  ;;  %v2059_v27 = vmax.f32 %v1837_v8, 0.0 }
 0x153   : > { %v1583_v16 = vpop.f32.mrf.mxu0  ;;  %v1839_v17 = vpop.f32.mrf.mxu1  ;;  %v1592_v30 = vadd.f32 %v2614_v10, %v3205_v9  ;;  %v1848_v31 = vadd.f32 %v2678_v18, %v3205_v9  ;;  %v2112_v10 = vadd.f32 %v2111_v55, %v2110_v34 }
 0x154   : > { %v1584_v22 = vadd.f32 %v3205_v9, %v1583_v16  ;;  %v1840_v23 = vadd.f32 %v3205_v9, %v1839_v17  ;;  %v2127_v24 = vadd.f32 %v2126_v14, %v1994_v12  ;;  %v3283_v25 = vadd.f32 %v2210_v15, %v2058_v13 }
 0x155   : > { %v2617_v28 = vpop.f32.mrf.mxu0  ;;  %v2681_v29 = vpop.f32.mrf.mxu1  ;;  %v1998_v47 = vmax.f32 %v1592_v30, 0.0  ;;  %v2062_v48 = vmax.f32 %v1848_v31, 0.0 }
 0x156   : > { %v1996_v32 = vmax.f32 %v1584_v22, 0.0  ;;  %v2060_v33 = vmax.f32 %v1840_v23, 0.0  ;;  %v2128_v35 = vrot.slane %v2127_v24, 4  ;;  %v1605_v60 = vadd.f32 %v2617_v28, %v3205_v9 }
 0x157   : > { %v1596_v36 = vpop.f32.mrf.mxu0  ;;  %v1852_v37 = vpop.f32.mrf.mxu1  ;;  %v1861_v12 = vadd.f32 %v2681_v29, %v3205_v9 }
 0x158   : > { %v2134_v40 = vadd.f32 %v1996_v32, %v1995_v26  ;;  %v2218_v41 = vadd.f32 %v2060_v33, %v2059_v27  ;;  %v2129_v42 = vadd.f32 %v2128_v35, %v2127_v24  ;;  %v1597_v43 = vadd.f32 %v3205_v9, %v1596_v36 }
 0x159   : > { %v1853_v44 = vadd.f32 %v3205_v9, %v1852_v37  ;;  %v2618_v45 = vpop.f32.mrf.mxu0  ;;  %v2682_v46 = vpop.f32.mrf.mxu1  ;;  %v2001_v11 = vmax.f32 %v1605_v60, 0.0  ;;  %v2065_v26 = vmax.f32 %v1861_v12, 0.0 }
 0x15a   : > { %v2135_v49 = vadd.f32 %v2134_v40, %v1997_v38  ;;  %v2219_v50 = vadd.f32 %v2218_v41, %v2061_v39  ;;  %v2130_v51 = vrot.slane %v2129_v42, 2  ;;  %v1999_v56 = vmax.f32 %v1597_v43, 0.0 }
 0x15b   : > { %v2063_v52 = vmax.f32 %v1853_v44, 0.0  ;;  %v1599_v53 = vpop.f32.mrf.mxu0  ;;  %v1855_v54 = vpop.f32.mrf.mxu1  ;;  %v1608_v2 = vadd.f32 %v2618_v45, %v3205_v9  ;;  %v1864_v27 = vadd.f32 %v2682_v46, %v3205_v9 }
 0x15c   : > { %v2136_v57 = vadd.f32 %v2135_v49, %v1998_v47  ;;  %v2220_v58 = vadd.f32 %v2219_v50, %v2062_v48  ;;  %v2131_v59 = vadd.f32 %v2130_v51, %v2129_v42  ;;  %v1600_v61 = vadd.f32 %v3205_v9, %v1599_v53 }
 0x15d   : > { %v1856_v62 = vadd.f32 %v3205_v9, %v1855_v54  ;;  %v2621_v63 = vpop.f32.mrf.mxu0  ;;  %v2685_v0 = vpop.f32.mrf.mxu1  ;;  %v2002_v16 = vmax.f32 %v1608_v2, 0.0  ;;  %v2066_v37 = vmax.f32 %v1864_v27, 0.0 }
 0x15e   : > { %v2137_v1 = vadd.f32 %v2136_v57, %v1999_v56  ;;  %v2132_v3 = vrot.slane %v2131_v59, 1  ;;  %v2221_v4 = vadd.f32 %v2220_v58, %v2063_v52  ;;  %v2000_v5 = vmax.f32 %v1600_v61, 0.0 }
 0x15f   : > { %v2064_v6 = vmax.f32 %v1856_v62, 0.0  ;;  %v1612_v7 = vpop.f32.mrf.mxu0  ;;  %v1868_v8 = vpop.f32.mrf.mxu1  ;;  %v1621_v42 = vadd.f32 %v2621_v63, %v3205_v9  ;;  %v1877_v51 = vadd.f32 %v2685_v0, %v3205_v9 }
 0x160   : > { %v2133_v18 = vadd.f32 %v2132_v3, %v2131_v59  ;;  %v2138_v13 = vadd.f32 %v2137_v1, %v2000_v5  ;;  %v1613_v22 = vadd.f32 %v3205_v9, %v1612_v7  ;;  %v1869_v34 = vadd.f32 %v3205_v9, %v1868_v8 }
 0x161   : > { %v2622_v14 = vpop.f32.mrf.mxu0  ;;  %v2686_v15 = vpop.f32.mrf.mxu1  ;;  %v2222_v21 = vadd.f32 %v2221_v4, %v2064_v6  ;;  %v2005_v54 = vmax.f32 %v1621_v42, 0.0  ;;  %v2069_v1 = vmax.f32 %v1877_v51, 0.0 }
 0x162   : > { %v3294_v17 = vsel %vm2268_vm2, %v2133_v18, %v2112_v10  ;;  %v2139_v20 = vadd.f32 %v2138_v13, %v2001_v11  ;;  %v2003_v33 = vmax.f32 %v1613_v22, 0.0  ;;  %v2067_v43 = vmax.f32 %v1869_v34, 0.0 }
 0x163   : > { %v1615_v23 = vpop.f32.mrf.mxu0  ;;  %v1871_v24 = vpop.f32.mrf.mxu1  ;;  %v2223_v32 = vadd.f32 %v2222_v21, %v2065_v26  ;;  %v1624_v52 = vadd.f32 %v2622_v14, %v3205_v9  ;;  %v1880_v53 = vadd.f32 %v2686_v15, %v3205_v9 }
 0x164   : > { %v2140_v28 = vadd.f32 %v2139_v20, %v2002_v16  ;;  %v1616_v30 = vadd.f32 %v3205_v9, %v1615_v23  ;;  %v1872_v45 = vadd.f32 %v3205_v9, %v1871_v24 }
 0x165   : > { %v2625_v31 = vpop.f32.mrf.mxu0  ;;  %v2689_v29 = vpop.f32.mrf.mxu1  ;;  %v2224_v44 = vadd.f32 %v2223_v32, %v2066_v37  ;;  %v2006_v2 = vmax.f32 %v1624_v52, 0.0  ;;  %v2070_v3 = vmax.f32 %v1880_v53, 0.0 }
 0x166   : > { %v2141_v38 = vadd.f32 %v2140_v28, %v2003_v33  ;;  %v2004_v39 = vmax.f32 %v1616_v30, 0.0  ;;  %v2068_v56 = vmax.f32 %v1872_v45, 0.0  ;;  %v3312_v4 = vadd.f32 %v2625_v31, %v3205_v9 }
 0x167   : > { %v1628_v35 = vpop.f32.mrf.mxu0  ;;  %v1884_v36 = vpop.f32.mrf.mxu1  ;;  %v2225_v55 = vadd.f32 %v2224_v44, %v2067_v43  ;;  %v3315_v5 = vadd.f32 %v2689_v29, %v3205_v9 }
 0x168   : > { %v2142_v48 = vadd.f32 %v2141_v38, %v2004_v39  ;;  %v1629_v6 = vadd.f32 %v3205_v9, %v1628_v35  ;;  %v2009_v28 = vmax.f32 %v3312_v4, 0.0  ;;  %v1885_v31 = vadd.f32 %v3205_v9, %v1884_v36 }
 0x169   : > { %v3300_v40 = vpop.f32.mrf.mxu0  ;;  %v3302_v41 = vpop.f32.mrf.mxu1  ;;  %v2226_v0 = vadd.f32 %v2225_v55, %v2068_v56 }
 0x16a   : > { %v2143_v59 = vadd.f32 %v2142_v48, %v2005_v54  ;;  %v2007_v30 = vmax.f32 %v1629_v6, 0.0  ;;  %v2071_v51 = vmax.f32 %v1885_v31, 0.0  ;;  %v2073_v6 = vmax.f32 %v3315_v5, 0.0 }
 0x16b   : > { %v1631_v46 = vpop.f32.mrf.mxu0  ;;  %v1887_v47 = vpop.f32.mrf.mxu1  ;;  %v2227_v27 = vadd.f32 %v2226_v0, %v2069_v1  ;;  %v1896_v5 = vadd.f32 %v3302_v41, %v3205_v9 }
 0x16c   : > { %v2144_v13 = vadd.f32 %v2143_v59, %v2006_v2  ;;  %v1632_v14 = vadd.f32 %v3205_v9, %v1631_v46  ;;  %v1888_v52 = vadd.f32 %v3205_v9, %v1887_v47 }
 0x16d   : > { %v2629_v49 = vpop.f32.mrf.mxu0  ;;  %v2693_v50 = vpop.f32.mrf.mxu1  ;;  %v2228_v36 = vadd.f32 %v2227_v27, %v2070_v3 }
 0x16e   : > { %v1653_v10 = vadd.f32 %v2629_v49, %v3205_v9  ;;  %v1909_v18 = vadd.f32 %v2693_v50, %v3205_v9  ;;  %v2145_v38 = vadd.f32 %v2144_v13, %v2007_v30  ;;  %v2008_v39 = vmax.f32 %v1632_v14, 0.0 }
 0x16f   : > { %v1644_v57 = vpop.f32.mrf.mxu0  ;;  %v1900_v58 = vpop.f32.mrf.mxu1 }
 0x170   : > { %v1645_v60 = vadd.f32 %v3205_v9, %v1644_v57  ;;  %v1901_v61 = vadd.f32 %v3205_v9, %v1900_v58  ;;  %v2013_v33 = vmax.f32 %v1653_v10, 0.0  ;;  %v2077_v34 = vmax.f32 %v1909_v18, 0.0 }
 0x171   : > { %v2630_v62 = vpop.f32.mrf.mxu0  ;;  %v2694_v63 = vpop.f32.mrf.mxu1  ;;  %v2146_v47 = vadd.f32 %v2145_v38, %v2008_v39 }
 0x172   : > { %v2011_v15 = vmax.f32 %v1645_v60, 0.0  ;;  %v2075_v16 = vmax.f32 %v1901_v61, 0.0  ;;  %v1656_v22 = vadd.f32 %v2630_v62, %v3205_v9  ;;  %v1912_v23 = vadd.f32 %v2694_v63, %v3205_v9 }
 0x173   : > { %v1647_v7 = vpop.f32.mrf.mxu0  ;;  %v1903_v8 = vpop.f32.mrf.mxu1  ;;  %v1640_v60 = vadd.f32 %v3300_v40, %v3205_v9 }
 0x174   : > { %v1648_v11 = vadd.f32 %v3205_v9, %v1647_v7  ;;  %v1904_v12 = vadd.f32 %v3205_v9, %v1903_v8  ;;  %v2014_v46 = vmax.f32 %v1656_v22, 0.0  ;;  %v2078_v48 = vmax.f32 %v1912_v23, 0.0 }
 0x175   : > { %v2633_v20 = vpop.f32.mrf.mxu0  ;;  %v2697_v21 = vpop.f32.mrf.mxu1 }
 0x176   : > { %v2012_v24 = vmax.f32 %v1648_v11, 0.0  ;;  %v2076_v26 = vmax.f32 %v1904_v12, 0.0  ;;  %v1669_v56 = vadd.f32 %v2633_v20, %v3205_v9  ;;  %v1925_v61 = vadd.f32 %v2697_v21, %v3205_v9 }
 0x177   : > { %v1660_v29 = vpop.f32.mrf.mxu0  ;;  %v1916_v32 = vpop.f32.mrf.mxu1  ;;  %v2229_v11 = vadd.f32 %v2228_v36, %v2071_v51  ;;  %v2072_v12 = vmax.f32 %v1888_v52, 0.0 }
 0x178   : > { %v2155_v35 = vadd.f32 %v2012_v24, %v2011_v15  ;;  %v2239_v37 = vadd.f32 %v2076_v26, %v2075_v16  ;;  %v1661_v42 = vadd.f32 %v3205_v9, %v1660_v29  ;;  %v1917_v43 = vadd.f32 %v3205_v9, %v1916_v32 }
 0x179   : > { %v2634_v44 = vpop.f32.mrf.mxu0  ;;  %v2698_v45 = vpop.f32.mrf.mxu1  ;;  %v2017_v13 = vmax.f32 %v1669_v56, 0.0  ;;  %v2081_v15 = vmax.f32 %v1925_v61, 0.0  ;;  %v2010_v24 = vmax.f32 %v1640_v60, 0.0  ;;  %v2147_v26 = vadd.f32 %v2146_v47, %v2009_v28 }
 0x17a   : > { %v2156_v49 = vadd.f32 %v2155_v35, %v2013_v33  ;;  %v2240_v50 = vadd.f32 %v2239_v37, %v2077_v34  ;;  %v2079_v53 = vmax.f32 %v1917_v43, 0.0  ;;  %v2015_v57 = vmax.f32 %v1661_v42, 0.0 }
 0x17b   : > { %v1663_v54 = vpop.f32.mrf.mxu0  ;;  %v1919_v55 = vpop.f32.mrf.mxu1  ;;  %v1672_v4 = vadd.f32 %v2634_v44, %v3205_v9  ;;  %v1928_v7 = vadd.f32 %v2698_v45, %v3205_v9  ;;  %v2230_v35 = vadd.f32 %v2229_v11, %v2072_v12 }
 0x17c   : > { %v2157_v58 = vadd.f32 %v2156_v49, %v2014_v46  ;;  %v2241_v59 = vadd.f32 %v2240_v50, %v2078_v48  ;;  %v1664_v62 = vadd.f32 %v3205_v9, %v1663_v54  ;;  %v1920_v63 = vadd.f32 %v3205_v9, %v1919_v55 }
 0x17d   : > { %v2637_v1 = vpop.f32.mrf.mxu0  ;;  %v2701_v2 = vpop.f32.mrf.mxu1  ;;  %v2018_v27 = vmax.f32 %v1672_v4, 0.0  ;;  %v2082_v30 = vmax.f32 %v1928_v7, 0.0  ;;  %v2148_v46 = vadd.f32 %v2147_v26, %v2010_v24  ;;  %v2231_v55 = vadd.f32 %v2230_v35, %v2073_v6 }
 0x17e   : > { %v2158_v3 = vadd.f32 %v2157_v58, %v2015_v57  ;;  %v2242_v0 = vadd.f32 %v2241_v59, %v2079_v53  ;;  %v2016_v8 = vmax.f32 %v1664_v62, 0.0  ;;  %v2080_v10 = vmax.f32 %v1920_v63, 0.0 }
 0x17f   : > { %v1676_v40 = vpop.f32.mrf.mxu0  ;;  %v1932_v18 = vpop.f32.mrf.mxu1  ;;  %v1685_v37 = vadd.f32 %v2637_v1, %v3205_v9  ;;  %v1941_v42 = vadd.f32 %v2701_v2, %v3205_v9  ;;  %v2191_v1 = vrot.slane %v3247_v19, 4  ;;  %v2074_v2 = vmax.f32 %v1896_v5, 0.0 }
 0x180   : > { %v1933_v14 = vadd.f32 %v3205_v9, %v1932_v18  ;;  %v2159_v16 = vadd.f32 %v2158_v3, %v2016_v8  ;;  %v2243_v20 = vadd.f32 %v2242_v0, %v2080_v10  ;;  %v1677_v21 = vadd.f32 %v3205_v9, %v1676_v40 }
 0x181   : > { %v2638_v22 = vpop.f32.mrf.mxu0  ;;  %v2702_v23 = vpop.f32.mrf.mxu1  ;;  %v2021_v56 = vmax.f32 %v1685_v37, 0.0  ;;  %v2085_v58 = vmax.f32 %v1941_v42, 0.0  ;;  %v2149_v47 = vrot.slane %v2148_v46, 4  ;;  %v2232_v40 = vadd.f32 %v2231_v55, %v2074_v2 }
 0x182   : > { %v2160_v31 = vadd.f32 %v2159_v16, %v2017_v13  ;;  %v2244_v29 = vadd.f32 %v2243_v20, %v2081_v15  ;;  %v2083_v32 = vmax.f32 %v1933_v14, 0.0  ;;  %v2019_v43 = vmax.f32 %v1677_v21, 0.0 }
 0x183   : > { %v1679_v33 = vpop.f32.mrf.mxu0  ;;  %v1935_v34 = vpop.f32.mrf.mxu1  ;;  %v1688_v48 = vadd.f32 %v2638_v22, %v3205_v9  ;;  %v1944_v52 = vadd.f32 %v2702_v23, %v3205_v9  ;;  %v2212_v20 = vrot.slane %v3283_v25, 4  ;;  %v2150_v21 = vadd.f32 %v2149_v47, %v2148_v46 }
 0x184   : > { %v1680_v38 = vadd.f32 %v3205_v9, %v1679_v33  ;;  %v1936_v39 = vadd.f32 %v3205_v9, %v1935_v34  ;;  %v2161_v44 = vadd.f32 %v2160_v31, %v2018_v27  ;;  %v2245_v41 = vadd.f32 %v2244_v29, %v2082_v30 }
 0x185   : > { %v2641_v28 = vpop.f32.mrf.mxu0  ;;  %v2705_v45 = vpop.f32.mrf.mxu1  ;;  %v2022_v3 = vmax.f32 %v1688_v48, 0.0  ;;  %v2086_v0 = vmax.f32 %v1944_v52, 0.0  ;;  %v2233_v30 = vrot.slane %v2232_v40, 4  ;;  %v2192_v34 = vadd.f32 %v2191_v1, %v3247_v19 }
 0x186   : > { %v2020_v49 = vmax.f32 %v1680_v38, 0.0  ;;  %v2084_v50 = vmax.f32 %v1936_v39, 0.0  ;;  %v2162_v51 = vadd.f32 %v2161_v44, %v2019_v43  ;;  %v2246_v36 = vadd.f32 %v2245_v41, %v2083_v32 }
 0x187   : > { %v1692_v53 = vpop.f32.mrf.mxu0  ;;  %v1948_v54 = vpop.f32.mrf.mxu1  ;;  %v1701_v18 = vadd.f32 %v2641_v28, %v3205_v9  ;;  %v1957_v13 = vadd.f32 %v2705_v45, %v3205_v9  ;;  %v2213_v35 = vadd.f32 %v2212_v20, %v3283_v25  ;;  %v2151_v37 = vrot.slane %v2150_v21, 2 }
 0x188   : > { %v1949_v57 = vadd.f32 %v3205_v9, %v1948_v54  ;;  %v2163_v59 = vadd.f32 %v2162_v51, %v2020_v49  ;;  %v2247_v60 = vadd.f32 %v2246_v36, %v2084_v50  ;;  %v1693_v61 = vadd.f32 %v3205_v9, %v1692_v53 }
 0x189   : > { %v2642_v62 = vpop.f32.mrf.mxu0  ;;  %v2706_v63 = vpop.f32.mrf.mxu1  ;;  %v2025_v31 = vmax.f32 %v1701_v18, 0.0  ;;  %v2089_v29 = vmax.f32 %v1957_v13, 0.0  ;;  %v2234_v44 = vadd.f32 %v2233_v30, %v2232_v40  ;;  %v2193_v45 = vrot.slane %v2192_v34, 2 }
 0x18a   : > { %v2164_v4 = vadd.f32 %v2163_v59, %v2021_v56  ;;  %v2248_v7 = vadd.f32 %v2247_v60, %v2085_v58  ;;  %v2087_v8 = vmax.f32 %v1949_v57, 0.0  ;;  %v2023_v14 = vmax.f32 %v1693_v61, 0.0 }
 0x18b   : > { %v1695_v6 = vpop.f32.mrf.mxu0  ;;  %v1951_v10 = vpop.f32.mrf.mxu1  ;;  %v1704_v26 = vadd.f32 %v2642_v62, %v3205_v9  ;;  %v1960_v27 = vadd.f32 %v2706_v63, %v3205_v9  ;;  %v2152_v46 = vadd.f32 %v2151_v37, %v2150_v21  ;;  %v2235_v50 = vrot.slane %v2234_v44, 2 }
 0x18c   : > { %v1696_v11 = vadd.f32 %v3205_v9, %v1695_v6  ;;  %v1952_v12 = vadd.f32 %v3205_v9, %v1951_v10  ;;  %v2165_v15 = vadd.f32 %v2164_v4, %v2022_v3  ;;  %v2249_v16 = vadd.f32 %v2248_v7, %v2086_v0 }
 0x18d   : > { %v2026_v38 = vmax.f32 %v1704_v26, 0.0  ;;  %v2090_v39 = vmax.f32 %v1960_v27, 0.0  ;;  %v2214_v9 = vrot.slane %v2213_v35, 2  ;;  %v2194_v52 = vadd.f32 %v2193_v45, %v2192_v34 }
 0x18e   : > { %v2024_v22 = vmax.f32 %v1696_v11, 0.0  ;;  %v2088_v23 = vmax.f32 %v1952_v12, 0.0  ;;  %v2166_v24 = vadd.f32 %v2165_v15, %v2023_v14  ;;  %v2250_v5 = vadd.f32 %v2249_v16, %v2087_v8  ;;  %v2091_v8 = vld [vmem:[#allocation2] sm:$0xff] }
 0x18f   : > { %v2153_v19 = vrot.slane %v2152_v46, 1  ;;  %v2215_v53 = vadd.f32 %v2214_v9, %v2213_v35  ;;  %v2236_v55 = vadd.f32 %v2235_v50, %v2234_v44  ;;  %v2195_v58 = vrot.slane %v2194_v52, 1 }
 0x190   : > { %v2167_v32 = vadd.f32 %v2166_v24, %v2024_v22  ;;  %v2251_v33 = vadd.f32 %v2250_v5, %v2088_v23 }
 0x191   : > { %v2154_v59 = vadd.f32 %v2153_v19, %v2152_v46  ;;  %v2216_v60 = vrot.slane %v2215_v53, 1  ;;  %v2237_v62 = vrot.slane %v2236_v55, 1  ;;  %v2196_v2 = vadd.f32 %v2195_v58, %v2194_v52 }
 0x192   : > { %v2168_v42 = vadd.f32 %v2167_v32, %v2025_v31  ;;  %v2252_v43 = vadd.f32 %v2251_v33, %v2089_v29 }
 0x193   : > { %v2271_v47 = vsel %vm2270_vm3, %v2154_v59, %v3294_v17  ;;  %v2217_v3 = vadd.f32 %v2216_v60, %v2215_v53  ;;  %v2238_v4 = vadd.f32 %v2237_v62, %v2236_v55 }
 0x194   : > { %v2169_v41 = vadd.f32 %v2168_v42, %v2026_v38  ;;  %v2253_v28 = vadd.f32 %v2252_v43, %v2090_v39 }
 0x196   : > { %v2170_v48 = vrot.slane %v2169_v41, 4  ;;  %v2254_v49 = vrot.slane %v2253_v28, 4 }
 0x198   : > { %v2171_v51 = vadd.f32 %v2170_v48, %v2169_v41  ;;  %v2255_v36 = vadd.f32 %v2254_v49, %v2253_v28 }
 0x19a   : > { %v2172_v25 = vrot.slane %v2171_v51, 2  ;;  %v2256_v54 = vrot.slane %v2255_v36, 2 }
 0x19c   : > { %v2173_v56 = vadd.f32 %v2172_v25, %v2171_v51  ;;  %v2257_v57 = vadd.f32 %v2256_v54, %v2255_v36 }
 0x19e   : > { %v2174_v61 = vrot.slane %v2173_v56, 1  ;;  %v2258_v1 = vrot.slane %v2257_v57, 1 }
 0x1a0   : > { %v2175_v63 = vadd.f32 %v2174_v61, %v2173_v56  ;;  %v2259_v6 = vadd.f32 %v2258_v1, %v2257_v57 }
 0x1a2   : > { %v2273_v0 = vsel %vm2272_vm4, %v2175_v63, %v2271_v47 }
 0x1a3   : > { %v2275_v7 = vsel %vm2274_vm5, %v2196_v2, %v2273_v0 }
 0x1a4   : > { %v2277_v10 = vsel %vm2276_vm6, %v2217_v3, %v2275_v7 }
 0x1a5   : > { %v2279_v40 = vsel %vm2278_vm7, %v2238_v4, %v2277_v10  ;;  %2288 = sbr.rel (%p2501_p10) target bundleno = 436 (0x1b4), region = 81 }
 0x1a6   : > { %v2281_v18 = vsel %vm2280_vm8, %v2259_v6, %v2279_v40 }
 0x1a7   : > { %v2283_v11 = vadd.f32 %v2281_v18, %v2091_v8 }
 0x1a9   : > { %2284 = vst [vmem:[#allocation2] sm:$0xff] %v2283_v11 }
 0x1b0   : > { %v2289_v12 = vld [vmem:[#allocation2] sm:$0xff] }
 0x1b1   : > { %v2290_v13 = vmul.f32 0.00390625, %v2289_v12 }
 0x1b3   : > { %2291 = vst [vmem:[%s3384_s3] sm:$0xff] %v2290_v13 }
 0x1b4 PF: > { %s13_s16 = sadd.s32 1, %s2861_s16   ;;  %s3385_s12 = smov %s2849_s13 }
 0x1b5   : > { %p10_p11 = scmp.ge.s32.totalorder %s13_s16, 4   ;;  %s3386_s13 = smov %s2919_s20 }
 0x1b6   : > { %s3387_s14 = smov %s2857_s15  ;;  %s3388_s15 = smov %s3390_s17 }
 0x1b7   :  { %12 = sbr.rel (!%p10_p11) target bundleno = 3 (0x3), region = 116 }

// kernel: byol_forward_train.3
= control target key start
LH: loop header
LB: loop body
LE: loop exit
PB: predicated region body
PF: predicated region fallthrough
CT: control target
= control target key end

     0   :  { %v980_v4 = vmov 0.0   ;;  %s1582_s0 = inlined_call_operand.vmem [shape: f32[4,128], index: 0, kind: input, shape index: {}]   ;;  %s1583_s1 = inlined_call_operand.vmem [shape: f32[128,256], index: 1, kind: input, shape index: {}]   ;;  %s1584_s2 = inlined_call_operand.vmem [shape: f32[1,256], index: 2, kind: input, shape index: {}]   ;;  %s1585_s3 = inlined_call_operand.vmem [shape: f32[1,256], index: 3, kind: input, shape index: {}]   ;;  %s1586_s4 = inlined_call_operand.vmem [shape: f32[1,256], index: 4, kind: input, shape index: {}]   ;;  %s1587_s5 = inlined_call_operand.vmem [shape: f32[256,256], index: 5, kind: input, shape index: {}]   ;;  %s1588_s6 = inlined_call_operand.vmem [shape: f32[1,256], index: 6, kind: input, shape index: {}]   ;;  %s1589_s7 = inlined_call_operand.vmem [shape: f32[128,128], index: 7, kind: input, shape index: {}]   ;;  %s1590_s8 = inlined_call_operand.vmem [shape: f32[1,128], index: 8, kind: input, shape index: {}]   ;;  %s1591_s9 = inlined_call_operand.vmem [shape: f32[1,128], index: 9, kind: input, shape index: {}]   ;;  %s1592_s10 = inlined_call_operand.vmem [shape: f32[1,128], index: 10, kind: input, shape index: {}]   ;;  %s1593_s11 = inlined_call_operand.vmem [shape: f32[128,128], index: 11, kind: input, shape index: {}]   ;;  %s1594_s12 = inlined_call_operand.vmem [shape: f32[1,128], index: 12, kind: input, shape index: {}]   ;;  %s1595_s13 = inlined_call_operand.hbm [shape: f32[1,128], index: 13, kind: output, shape index: {}]  }
   0x1   :  { %v77_v0 = vld [vmem:[%s1583_s1 + $0xf8] sm:$0xff]  ;;  %v76_v1 = vld [vmem:[%s1583_s1 + $0xf0] sm:$0xff]  ;;  %v75_v2 = vld [vmem:[%s1583_s1 + $0xe8] sm:$0xff]  ;;  %154 = vmatprep.mubr.f32.mxu0 %v980_v4 }
   0x2   :  { %90 = vmatprep.subr.mxu0 %v77_v0  ;;  %v74_v3 = vld [vmem:[%s1583_s1 + $0xe0] sm:$0xff]  ;;  %v73_v5 = vld [vmem:[%s1583_s1 + $0xd8] sm:$0xff]  ;;  %v72_v6 = vld [vmem:[%s1583_s1 + $0xd0] sm:$0xff] }
   0x3   :  { %91 = vmatpush1.msra.mxu0 %v76_v1  ;;  %v71_v7 = vld [vmem:[%s1583_s1 + $0xc8] sm:$0xff]  ;;  %v70_v8 = vld [vmem:[%s1583_s1 + $0xc0] sm:$0xff]  ;;  %v69_v9 = vld [vmem:[%s1583_s1 + $0xb8] sm:$0xff] }
   0x4   :  { %92 = vmatprep.subr.mxu0 %v75_v2  ;;  %v68_v10 = vld [vmem:[%s1583_s1 + $0xb0] sm:$0xff]  ;;  %v67_v11 = vld [vmem:[%s1583_s1 + $0xa8] sm:$0xff]  ;;  %v66_v12 = vld [vmem:[%s1583_s1 + $0xa0] sm:$0xff] }
   0x5   :  { %93 = vmatpush1.msra.mxu0 %v74_v3  ;;  %v65_v13 = vld [vmem:[%s1583_s1 + $0x98] sm:$0xff]  ;;  %v64_v14 = vld [vmem:[%s1583_s1 + $0x90] sm:$0xff] }
   0x6   :  { %94 = vmatprep.subr.mxu0 %v73_v5 }
   0x7   :  { %95 = vmatpush1.msra.mxu0 %v72_v6 }
   0x8   :  { %96 = vmatprep.subr.mxu0 %v71_v7 }
   0x9   :  { %97 = vmatpush1.msra.mxu0 %v70_v8 }
   0xa   :  { %98 = vmatprep.subr.mxu0 %v69_v9 }
   0xb   :  { %99 = vmatpush1.msra.mxu0 %v68_v10 }
   0xc   :  { %100 = vmatprep.subr.mxu0 %v67_v11 }
   0xd   :  { %18 = vsyncpa [#allocation3], 0  ;;  %101 = vmatpush1.msra.mxu0 %v66_v12  ;;  %v63_v15 = vld [vmem:[%s1583_s1 + $0x88] sm:$0xff]  ;;  %v62_v16 = vld [vmem:[%s1583_s1 + $0x80] sm:$0xff]  ;;  %vm171_vm1 = vcmask 1043456   ;;  %vm981_vm2 = vmmov 0  }
   0xe   :  { %102 = vmatprep.subr.mxu0 %v65_v13  ;;  %v61_v17 = vld [vmem:[%s1583_s1 + $0x78] sm:$0xff]  ;;  %v60_v18 = vld [vmem:[%s1583_s1 + $0x70] sm:$0xff]  ;;  %v59_v19 = vld [vmem:[%s1583_s1 + $0x68] sm:$0xff]  ;;  %vm799_vm4 = vcmask 27648  }
   0xf   :  { %103 = vmatpush1.msra.mxu0 %v64_v14  ;;  %v58_v20 = vld [vmem:[%s1583_s1 + $0x60] sm:$0xff]  ;;  %v57_v21 = vld [vmem:[%s1583_s1 + $0x58] sm:$0xff]  ;;  %v56_v22 = vld [vmem:[%s1583_s1 + $0x50] sm:$0xff] }
  0x10   :  { %104 = vmatprep.subr.mxu0 %v63_v15  ;;  %v55_v23 = vld [vmem:[%s1583_s1 + $0x48] sm:$0xff]  ;;  %v54_v24 = vld [vmem:[%s1583_s1 + $0x40] sm:$0xff]  ;;  %v53_v25 = vld [vmem:[%s1583_s1 + $0x38] sm:$0xff] }
  0x11   :  { %105 = vmatpush1.msra.mxu0 %v62_v16  ;;  %v52_v26 = vld [vmem:[%s1583_s1 + $0x30] sm:$0xff]  ;;  %v51_v27 = vld [vmem:[%s1583_s1 + $0x28] sm:$0xff]  ;;  %v50_v28 = vld [vmem:[%s1583_s1 + $0x20] sm:$0xff] }
  0x12   :  { %106 = vmatprep.subr.mxu0 %v61_v17  ;;  %v49_v29 = vld [vmem:[%s1583_s1 + $0x18] sm:$0xff]  ;;  %v48_v30 = vld [vmem:[%s1583_s1 + $0x10] sm:$0xff]  ;;  %v47_v31 = vld [vmem:[%s1583_s1 + $0x8] sm:$0xff] }
  0x13   :  { %107 = vmatpush1.msra.mxu0 %v60_v18  ;;  %v46_v32 = vld [vmem:[%s1583_s1] sm:$0xff]  ;;  %v329_v34 = vld [vmem:[%s1587_s5 + $0xf8] sm:$0xff]  ;;  %v328_v35 = vld [vmem:[%s1587_s5 + $0xf0] sm:$0xff] }
  0x14   :  { %108 = vmatprep.subr.mxu0 %v59_v19  ;;  %v45_v33 = vld [vmem:[%s1582_s0] sm:$0xf]  ;;  %374 = vmatprep.subr.mxu1 %v329_v34  ;;  %v327_v36 = vld [vmem:[%s1587_s5 + $0xe8] sm:$0xff]  ;;  %v325_v38 = vld [vmem:[%s1587_s5 + $0xd8] sm:$0xff] }
  0x15   :  { %109 = vmatpush1.msra.mxu0 %v58_v20  ;;  %375 = vmatpush1.msra.mxu1 %v328_v35  ;;  %v326_v37 = vld [vmem:[%s1587_s5 + $0xe0] sm:$0xff]  ;;  %v324_v39 = vld [vmem:[%s1587_s5 + $0xd0] sm:$0xff]  ;;  %v323_v40 = vld [vmem:[%s1587_s5 + $0xc8] sm:$0xff] }
  0x16   :  { %110 = vmatprep.subr.mxu0 %v57_v21  ;;  %376 = vmatprep.subr.mxu1 %v327_v36  ;;  %v322_v41 = vld [vmem:[%s1587_s5 + $0xc0] sm:$0xff]  ;;  %v321_v42 = vld [vmem:[%s1587_s5 + $0xb8] sm:$0xff]  ;;  %v320_v43 = vld [vmem:[%s1587_s5 + $0xb0] sm:$0xff] }
  0x17   :  { %111 = vmatpush1.msra.mxu0 %v56_v22  ;;  %377 = vmatpush1.msra.mxu1 %v326_v37  ;;  %v319_v44 = vld [vmem:[%s1587_s5 + $0xa8] sm:$0xff]  ;;  %v318_v45 = vld [vmem:[%s1587_s5 + $0xa0] sm:$0xff]  ;;  %v317_v46 = vld [vmem:[%s1587_s5 + $0x98] sm:$0xff] }
  0x18   :  { %112 = vmatprep.subr.mxu0 %v55_v23  ;;  %378 = vmatprep.subr.mxu1 %v325_v38  ;;  %v316_v47 = vld [vmem:[%s1587_s5 + $0x90] sm:$0xff]  ;;  %v315_v48 = vld [vmem:[%s1587_s5 + $0x88] sm:$0xff]  ;;  %v314_v49 = vld [vmem:[%s1587_s5 + $0x80] sm:$0xff] }
  0x19   :  { %113 = vmatpush1.msra.mxu0 %v54_v24  ;;  %379 = vmatpush1.msra.mxu1 %v324_v39  ;;  %v313_v50 = vld [vmem:[%s1587_s5 + $0x78] sm:$0xff]  ;;  %v312_v51 = vld [vmem:[%s1587_s5 + $0x70] sm:$0xff]  ;;  %v311_v52 = vld [vmem:[%s1587_s5 + $0x68] sm:$0xff] }
  0x1a   :  { %114 = vmatprep.subr.mxu0 %v53_v25  ;;  %380 = vmatprep.subr.mxu1 %v323_v40  ;;  %v310_v53 = vld [vmem:[%s1587_s5 + $0x60] sm:$0xff]  ;;  %v309_v54 = vld [vmem:[%s1587_s5 + $0x58] sm:$0xff]  ;;  %v308_v55 = vld [vmem:[%s1587_s5 + $0x50] sm:$0xff] }
  0x1b   :  { %115 = vmatpush1.msra.mxu0 %v52_v26  ;;  %381 = vmatpush1.msra.mxu1 %v322_v41  ;;  %v307_v56 = vld [vmem:[%s1587_s5 + $0x48] sm:$0xff]  ;;  %v306_v57 = vld [vmem:[%s1587_s5 + $0x40] sm:$0xff]  ;;  %v305_v58 = vld [vmem:[%s1587_s5 + $0x38] sm:$0xff] }
  0x1c   :  { %116 = vmatprep.subr.mxu0 %v51_v27  ;;  %382 = vmatprep.subr.mxu1 %v321_v42  ;;  %v304_v59 = vld [vmem:[%s1587_s5 + $0x30] sm:$0xff]  ;;  %v303_v60 = vld [vmem:[%s1587_s5 + $0x28] sm:$0xff]  ;;  %v302_v61 = vld [vmem:[%s1587_s5 + $0x20] sm:$0xff] }
  0x1d   :  { %117 = vmatpush1.msra.mxu0 %v50_v28  ;;  %383 = vmatpush1.msra.mxu1 %v320_v43  ;;  %v301_v62 = vld [vmem:[%s1587_s5 + $0x18] sm:$0xff]  ;;  %v300_v63 = vld [vmem:[%s1587_s5 + $0x10] sm:$0xff]  ;;  %v299_v0 = vld [vmem:[%s1587_s5 + $0x8] sm:$0xff] }
  0x1e   :  { %118 = vmatprep.subr.mxu0 %v49_v29  ;;  %384 = vmatprep.subr.mxu1 %v319_v44  ;;  %v298_v1 = vld [vmem:[%s1587_s5] sm:$0xff]  ;;  %v361_v2 = vld [vmem:[%s1587_s5 + $0x1f8] sm:$0xff]  ;;  %v360_v3 = vld [vmem:[%s1587_s5 + $0x1f0] sm:$0xff] }
  0x1f   :  { %119 = vmatpush1.msra.mxu0 %v48_v30  ;;  %385 = vmatpush1.msra.mxu1 %v318_v45  ;;  %v359_v5 = vld [vmem:[%s1587_s5 + $0x1e8] sm:$0xff]  ;;  %v358_v6 = vld [vmem:[%s1587_s5 + $0x1e0] sm:$0xff]  ;;  %v357_v7 = vld [vmem:[%s1587_s5 + $0x1d8] sm:$0xff] }
  0x20   :  { %120 = vmatprep.subr.mxu0 %v47_v31  ;;  %386 = vmatprep.subr.mxu1 %v317_v46  ;;  %v356_v8 = vld [vmem:[%s1587_s5 + $0x1d0] sm:$0xff]  ;;  %v355_v9 = vld [vmem:[%s1587_s5 + $0x1c8] sm:$0xff]  ;;  %v354_v10 = vld [vmem:[%s1587_s5 + $0x1c0] sm:$0xff] }
  0x21   :  { %121 = vmatpush1.msra.mxu0 %v46_v32  ;;  %387 = vmatpush1.msra.mxu1 %v316_v47  ;;  %v353_v11 = vld [vmem:[%s1587_s5 + $0x1b8] sm:$0xff]  ;;  %v352_v12 = vld [vmem:[%s1587_s5 + $0x1b0] sm:$0xff]  ;;  %v351_v13 = vld [vmem:[%s1587_s5 + $0x1a8] sm:$0xff] }
  0x22   :  { %155 = vmatmul.mubr.f32.vlgmr.msra.gmra.mxu0 %v45_v33  ;;  %868 = vmatprep.subr.mxu0 %v980_v4  ;;  %v350_v14 = vld [vmem:[%s1587_s5 + $0x1a0] sm:$0xff]  ;;  %v349_v15 = vld [vmem:[%s1587_s5 + $0x198] sm:$0xff]  ;;  %v348_v16 = vld [vmem:[%s1587_s5 + $0x190] sm:$0xff] }
  0x23   :  { %388 = vmatprep.subr.mxu1 %v315_v48  ;;  %v347_v17 = vld [vmem:[%s1587_s5 + $0x188] sm:$0xff]  ;;  %v346_v18 = vld [vmem:[%s1587_s5 + $0x180] sm:$0xff]  ;;  %v345_v19 = vld [vmem:[%s1587_s5 + $0x178] sm:$0xff]  ;;  %900 = vmatprep.mubr.msk.f32.mxu0 %vm981_vm2, %v980_v4 }
  0x24   :  { %389 = vmatpush1.msra.mxu1 %v314_v49  ;;  %v344_v20 = vld [vmem:[%s1587_s5 + $0x170] sm:$0xff]  ;;  %v343_v21 = vld [vmem:[%s1587_s5 + $0x168] sm:$0xff]  ;;  %v342_v22 = vld [vmem:[%s1587_s5 + $0x160] sm:$0xff]  ;;  %v80_v49 = vlaneseq }
  0x25   :  { %390 = vmatprep.subr.mxu1 %v313_v50  ;;  %v341_v23 = vld [vmem:[%s1587_s5 + $0x158] sm:$0xff]  ;;  %v340_v24 = vld [vmem:[%s1587_s5 + $0x150] sm:$0xff]  ;;  %v339_v25 = vld [vmem:[%s1587_s5 + $0x148] sm:$0xff] }
  0x26   :  { %391 = vmatpush1.msra.mxu1 %v312_v51  ;;  %v338_v26 = vld [vmem:[%s1587_s5 + $0x140] sm:$0xff]  ;;  %v337_v27 = vld [vmem:[%s1587_s5 + $0x138] sm:$0xff]  ;;  %v336_v28 = vld [vmem:[%s1587_s5 + $0x130] sm:$0xff]  ;;  %v1404_v50 = vshrl.u32 %v80_v49, 7 }
  0x27   :  { %392 = vmatprep.subr.mxu1 %v311_v52  ;;  %v335_v29 = vld [vmem:[%s1587_s5 + $0x128] sm:$0xff]  ;;  %v334_v30 = vld [vmem:[%s1587_s5 + $0x120] sm:$0xff]  ;;  %v333_v31 = vld [vmem:[%s1587_s5 + $0x118] sm:$0xff] }
  0x28   :  { %393 = vmatpush1.msra.mxu1 %v310_v53  ;;  %v332_v32 = vld [vmem:[%s1587_s5 + $0x110] sm:$0xff]  ;;  %v331_v33 = vld [vmem:[%s1587_s5 + $0x108] sm:$0xff]  ;;  %v330_v34 = vld [vmem:[%s1587_s5 + $0x100] sm:$0xff]  ;;  %v1407_v51 = vsub.s32 0, %v1404_v50  ;;  %vm165_vm0 = vcmp.lt.s32.totalorder %v1404_v50, 2  ;;  %v1414_v53 = vsub.s32 1, %v1404_v50 }
  0x29   :  { %394 = vmatprep.subr.mxu1 %v309_v54  ;;  %v460_v35 = vld [vmem:[%s1589_s7 + $0x78] sm:$0xff]  ;;  %v459_v36 = vld [vmem:[%s1589_s7 + $0x70] sm:$0xff]  ;;  %v458_v37 = vld [vmem:[%s1589_s7 + $0x68] sm:$0xff]  ;;  %v1417_v54 = vsel %vm165_vm0, 1.0, %v980_v4 }
  0x2a   :  { %395 = vmatpush1.msra.mxu1 %v308_v55  ;;  %869 = vmatpush3.msra.mxu0 %v460_v35  ;;  %v457_v38 = vld [vmem:[%s1589_s7 + $0x60] sm:$0xff]  ;;  %v456_v39 = vld [vmem:[%s1589_s7 + $0x58] sm:$0xff]  ;;  %v455_v40 = vld [vmem:[%s1589_s7 + $0x50] sm:$0xff] }
  0x2b   :  { %396 = vmatprep.subr.mxu1 %v307_v56  ;;  %870 = vmatprep.subr.mxu0 %v980_v4  ;;  %v454_v41 = vld [vmem:[%s1589_s7 + $0x48] sm:$0xff]  ;;  %v453_v42 = vld [vmem:[%s1589_s7 + $0x40] sm:$0xff]  ;;  %v452_v43 = vld [vmem:[%s1589_s7 + $0x38] sm:$0xff]  ;;  %v1421_v56 = vsub.f32 1.0, %v1417_v54 }
  0x2c   :  { %397 = vmatpush1.msra.mxu1 %v306_v57  ;;  %871 = vmatpush3.msra.mxu0 %v459_v36  ;;  %v451_v44 = vld [vmem:[%s1589_s7 + $0x30] sm:$0xff]  ;;  %v450_v45 = vld [vmem:[%s1589_s7 + $0x28] sm:$0xff]  ;;  %v449_v46 = vld [vmem:[%s1589_s7 + $0x20] sm:$0xff] }
  0x2d   :  { %398 = vmatprep.subr.mxu1 %v305_v58  ;;  %872 = vmatprep.subr.mxu0 %v980_v4  ;;  %v448_v47 = vld [vmem:[%s1589_s7 + $0x18] sm:$0xff]  ;;  %v447_v48 = vld [vmem:[%s1589_s7 + $0x10] sm:$0xff]  ;;  %v78_v52 = vld [vmem:[%s1584_s2] sm:$0x3] }
  0x2e   :  { %399 = vmatpush1.msra.mxu1 %v304_v59  ;;  %873 = vmatpush3.msra.mxu0 %v458_v37  ;;  %v83_v55 = vrot.slane %v78_v52, %v1407_v51  ;;  %v87_v57 = vrot.slane %v78_v52, %v1414_v53 }
  0x2f   :  { %400 = vmatprep.subr.mxu1 %v303_v60  ;;  %874 = vmatprep.subr.mxu0 %v980_v4 }
  0x30   :  { %401 = vmatpush1.msra.mxu1 %v302_v61  ;;  %875 = vmatpush3.msra.mxu0 %v457_v38 }
  0x31   :  { %402 = vmatprep.subr.mxu1 %v301_v62  ;;  %876 = vmatprep.subr.mxu0 %v980_v4 }
  0x32   :  { %403 = vmatpush1.msra.mxu1 %v300_v63  ;;  %877 = vmatpush3.msra.mxu0 %v456_v39 }
  0x33   :  { %404 = vmatprep.subr.mxu1 %v299_v0  ;;  %878 = vmatprep.subr.mxu0 %v980_v4 }
  0x34   :  { %405 = vmatpush1.msra.mxu1 %v298_v1  ;;  %879 = vmatpush3.msra.mxu0 %v455_v40 }
  0x35   :  { %406 = vmatprep.subr.mxu1 %v361_v2  ;;  %880 = vmatprep.subr.mxu0 %v980_v4 }
  0x36   :  { %407 = vmatpush2.msra.mxu1 %v360_v3  ;;  %881 = vmatpush3.msra.mxu0 %v454_v41 }
  0x37   :  { %408 = vmatprep.subr.mxu1 %v359_v5  ;;  %882 = vmatprep.subr.mxu0 %v980_v4 }
  0x38   :  { %409 = vmatpush2.msra.mxu1 %v358_v6  ;;  %883 = vmatpush3.msra.mxu0 %v453_v42 }
  0x39   :  { %410 = vmatprep.subr.mxu1 %v357_v7  ;;  %884 = vmatprep.subr.mxu0 %v980_v4 }
  0x3a   :  { %411 = vmatpush2.msra.mxu1 %v356_v8  ;;  %885 = vmatpush3.msra.mxu0 %v452_v43 }
  0x3b   :  { %412 = vmatprep.subr.mxu1 %v355_v9  ;;  %886 = vmatprep.subr.mxu0 %v980_v4 }
  0x3c   :  { %413 = vmatpush2.msra.mxu1 %v354_v10  ;;  %887 = vmatpush3.msra.mxu0 %v451_v44 }
  0x3d   :  { %414 = vmatprep.subr.mxu1 %v353_v11  ;;  %888 = vmatprep.subr.mxu0 %v980_v4 }
  0x3e   :  { %415 = vmatpush2.msra.mxu1 %v352_v12  ;;  %889 = vmatpush3.msra.mxu0 %v450_v45 }
  0x3f   :  { %416 = vmatprep.subr.mxu1 %v351_v13  ;;  %890 = vmatprep.subr.mxu0 %v980_v4 }
  0x40   :  { %417 = vmatpush2.msra.mxu1 %v350_v14  ;;  %891 = vmatpush3.msra.mxu0 %v449_v46 }
  0x41   :  { %418 = vmatprep.subr.mxu1 %v349_v15  ;;  %892 = vmatprep.subr.mxu0 %v980_v4 }
  0x42   :  { %419 = vmatpush2.msra.mxu1 %v348_v16  ;;  %893 = vmatpush3.msra.mxu0 %v448_v47 }
  0x43   :  { %420 = vmatprep.subr.mxu1 %v347_v17  ;;  %894 = vmatprep.subr.mxu0 %v980_v4 }
  0x44   :  { %421 = vmatpush2.msra.mxu1 %v346_v18  ;;  %895 = vmatpush3.msra.mxu0 %v447_v48 }
  0x45   :  { %422 = vmatprep.subr.mxu1 %v345_v19  ;;  %896 = vmatprep.subr.mxu0 %v980_v4 }
  0x46   :  { %423 = vmatpush2.msra.mxu1 %v344_v20 }
  0x47   :  { %424 = vmatprep.subr.mxu1 %v343_v21 }
  0x48   :  { %425 = vmatpush2.msra.mxu1 %v342_v22 }
  0x49   :  { %426 = vmatprep.subr.mxu1 %v341_v23 }
  0x4a   :  { %427 = vmatpush2.msra.mxu1 %v340_v24 }
  0x4b   :  { %428 = vmatprep.subr.mxu1 %v339_v25 }
  0x4c   :  { %429 = vmatpush2.msra.mxu1 %v338_v26 }
  0x4d   :  { %430 = vmatprep.subr.mxu1 %v337_v27 }
  0x4e   :  { %431 = vmatpush2.msra.mxu1 %v336_v28 }
  0x4f   :  { %432 = vmatprep.subr.mxu1 %v335_v29 }
  0x50   :  { %433 = vmatpush2.msra.mxu1 %v334_v30 }
  0x51   :  { %434 = vmatprep.subr.mxu1 %v333_v31 }
  0x52   :  { %435 = vmatpush2.msra.mxu1 %v332_v32 }
  0x53   :  { %436 = vmatprep.subr.mxu1 %v331_v33 }
  0x54   :  { %437 = vmatpush2.msra.mxu1 %v330_v34 }
  0x55   :  { %938 = vmatprep.subr.mxu1 %v980_v4 }
  0xe2   :  { %v156_v58 = vpop.f32.mrf.mxu0 }
  0xe3   :  { %v1424_v59 = vadd.f32 %v156_v58, %v83_v55 }
  0xe4   :  { %v158_v60 = vpop.f32.mrf.mxu0 }
  0xe5   :  { %v169_v61 = vmul.f32 %v1417_v54, %v1424_v59  ;;  %v188_v62 = vmul.f32 %v1421_v56, %v1424_v59  ;;  %v1430_v63 = vadd.f32 %v158_v60, %v87_v57 }
  0xe7   :  { %v172_v0 = vsel %vm171_vm1, %v169_v61, 0.0  ;;  %v190_v1 = vsel %vm171_vm1, %v188_v62, 0.0  ;;  %v170_v2 = vmul.f32 %v1417_v54, %v1430_v63  ;;  %v189_v3 = vmul.f32 %v1421_v56, %v1430_v63 }
  0xe8   :  { %v173_v5 = vrot.slane %v172_v0, 4  ;;  %v191_v6 = vrot.slane %v190_v1, 4 }
  0xe9   :  { %v179_v7 = vsel %vm171_vm1, %v170_v2, 0.0  ;;  %v197_v8 = vsel %vm171_vm1, %v189_v3, 0.0 }
  0xea   :  { %v174_v9 = vadd.f32 %v173_v5, %v172_v0  ;;  %v192_v10 = vadd.f32 %v191_v6, %v190_v1  ;;  %v180_v11 = vrot.slane %v179_v7, 4  ;;  %v198_v12 = vrot.slane %v197_v8, 4 }
  0xec   :  { %v175_v13 = vrot.slane %v174_v9, 2  ;;  %v193_v14 = vrot.slane %v192_v10, 2  ;;  %v181_v15 = vadd.f32 %v180_v11, %v179_v7  ;;  %v199_v16 = vadd.f32 %v198_v12, %v197_v8 }
  0xee   :  { %v176_v17 = vadd.f32 %v175_v13, %v174_v9  ;;  %v194_v18 = vadd.f32 %v193_v14, %v192_v10  ;;  %v182_v19 = vrot.slane %v181_v15, 2  ;;  %v200_v20 = vrot.slane %v199_v16, 2 }
  0xf0   :  { %v177_v21 = vrot.slane %v176_v17, 1  ;;  %v195_v22 = vrot.slane %v194_v18, 1  ;;  %v183_v23 = vadd.f32 %v182_v19, %v181_v15  ;;  %v201_v24 = vadd.f32 %v200_v20, %v199_v16 }
  0xf2   :  { %v178_v25 = vadd.f32 %v177_v21, %v176_v17  ;;  %v196_v26 = vadd.f32 %v195_v22, %v194_v18  ;;  %v184_v27 = vrot.slane %v183_v23, 1  ;;  %v202_v28 = vrot.slane %v201_v24, 1 }
  0xf4   :  { %v186_v29 = vmul.f32 0.5, %v178_v25  ;;  %v204_v30 = vmul.f32 0.5, %v196_v26  ;;  %v185_v31 = vadd.f32 %v184_v27, %v183_v23  ;;  %v203_v32 = vadd.f32 %v202_v28, %v201_v24 }
  0xf6   :  { %v206_v33 = vsub.f32 %v1424_v59, %v186_v29  ;;  %v228_v34 = vsub.f32 %v1424_v59, %v204_v30  ;;  %v187_v35 = vmul.f32 0.5, %v185_v31  ;;  %v205_v36 = vmul.f32 0.5, %v203_v32 }
  0xf8   :  { %v208_v37 = vmul.f32 %v206_v33, %v206_v33  ;;  %v230_v38 = vmul.f32 %v228_v34, %v228_v34  ;;  %v207_v39 = vsub.f32 %v1430_v63, %v187_v35  ;;  %v229_v40 = vsub.f32 %v1430_v63, %v205_v36 }
  0xf9   :  { %v250_v34 = vmul.f32 %v1417_v54, %v186_v29 }
  0xfa   :  { %v210_v41 = vmul.f32 %v1417_v54, %v208_v37  ;;  %v232_v42 = vmul.f32 %v230_v38, %v1421_v56  ;;  %v209_v43 = vmul.f32 %v207_v39, %v207_v39  ;;  %v231_v44 = vmul.f32 %v229_v40, %v229_v40 }
  0xfb   :  { %v252_v37 = vmul.f32 %v204_v30, %v1421_v56  ;;  %v251_v38 = vmul.f32 %v1417_v54, %v187_v35  ;;  %v253_v39 = vmul.f32 %v205_v36, %v1421_v56 }
  0xfc   :  { %v212_v45 = vsel %vm171_vm1, %v210_v41, 0.0  ;;  %v234_v46 = vsel %vm171_vm1, %v232_v42, 0.0  ;;  %v211_v47 = vmul.f32 %v1417_v54, %v209_v43  ;;  %v233_v48 = vmul.f32 %v231_v44, %v1421_v56  ;;  %v161_v41 = vld [vmem:[%s1585_s3] sm:$0x3] }
  0xfd   :  { %v213_v52 = vrot.slane %v212_v45, 4  ;;  %v235_v55 = vrot.slane %v234_v46, 4  ;;  %v254_v40 = vadd.f32 %v252_v37, %v250_v34  ;;  %v255_v42 = vadd.f32 %v253_v39, %v251_v38  ;;  %v162_v43 = vld [vmem:[%s1586_s4] sm:$0x3] }
  0xfe   :  { %v219_v57 = vsel %vm171_vm1, %v211_v47, 0.0  ;;  %v241_v58 = vsel %vm171_vm1, %v233_v48, 0.0  ;;  %v274_v44 = vrot.slane %v161_v41, %v1407_v51  ;;  %v278_v35 = vrot.slane %v161_v41, %v1414_v53 }
  0xff   :  { %v214_v60 = vadd.f32 %v213_v52, %v212_v45  ;;  %v236_v61 = vadd.f32 %v235_v55, %v234_v46  ;;  %v220_v62 = vrot.slane %v219_v57, 4  ;;  %v242_v0 = vrot.slane %v241_v58, 4 }
 0x100   :  { %v262_v29 = vsub.f32 %v1424_v59, %v254_v40  ;;  %v263_v30 = vsub.f32 %v1430_v63, %v255_v42  ;;  %v287_v47 = vrot.slane %v162_v43, %v1407_v51  ;;  %v291_v52 = vrot.slane %v162_v43, %v1414_v53  ;;  %v446_v59 = vld [vmem:[%s1589_s7 + $0x8] sm:$0xff]  ;;  %v445_v63 = vld [vmem:[%s1589_s7] sm:$0xff] }
 0x101   :  { %v215_v1 = vrot.slane %v214_v60, 2  ;;  %v237_v2 = vrot.slane %v236_v61, 2  ;;  %v221_v3 = vadd.f32 %v220_v62, %v219_v57  ;;  %v243_v5 = vadd.f32 %v242_v0, %v241_v58  ;;  %897 = vmatpush3.msra.mxu0 %v446_v59  ;;  %v362_v0 = vld [vmem:[%s1588_s6] sm:$0x3] }
 0x102   :  { %898 = vmatprep.subr.mxu0 %v980_v4 }
 0x103   :  { %v216_v6 = vadd.f32 %v215_v1, %v214_v60  ;;  %v238_v7 = vadd.f32 %v237_v2, %v236_v61  ;;  %v222_v8 = vrot.slane %v221_v3, 2  ;;  %v244_v9 = vrot.slane %v243_v5, 2  ;;  %899 = vmatpush3.msra.mxu0 %v445_v63 }
 0x104   :  { %903 = vmatprep.subr.mxu0 %v980_v4  ;;  %v367_v1 = vrot.slane %v362_v0, %v1407_v51  ;;  %v371_v2 = vrot.slane %v362_v0, %v1414_v53  ;;  %v619_v51 = vld [vmem:[%s1593_s11 + $0x70] sm:$0xff]  ;;  %v618_v53 = vld [vmem:[%s1593_s11 + $0x68] sm:$0xff] }
 0x105   :  { %v217_v10 = vrot.slane %v216_v6, 1  ;;  %v239_v11 = vrot.slane %v238_v7, 1  ;;  %v223_v12 = vadd.f32 %v222_v8, %v221_v3  ;;  %v245_v13 = vadd.f32 %v244_v9, %v243_v5 }
 0x107   :  { %v218_v14 = vadd.f32 %v217_v10, %v216_v6  ;;  %v240_v15 = vadd.f32 %v239_v11, %v238_v7  ;;  %v224_v16 = vrot.slane %v223_v12, 1  ;;  %v246_v17 = vrot.slane %v245_v13, 1  ;;  %v620_v10 = vld [vmem:[%s1593_s11 + $0x78] sm:$0xff]  ;;  %v617_v11 = vld [vmem:[%s1593_s11 + $0x60] sm:$0xff] }
 0x109   :  { %v226_v18 = vmul.f32 0.5, %v218_v14  ;;  %v248_v19 = vmul.f32 0.5, %v240_v15  ;;  %v225_v20 = vadd.f32 %v224_v16, %v223_v12  ;;  %v247_v21 = vadd.f32 %v246_v17, %v245_v13  ;;  %v616_v12 = vld [vmem:[%s1593_s11 + $0x58] sm:$0xff]  ;;  %v615_v13 = vld [vmem:[%s1593_s11 + $0x50] sm:$0xff]  ;;  %v614_v14 = vld [vmem:[%s1593_s11 + $0x48] sm:$0xff] }
 0x10a   :  { %v613_v15 = vld [vmem:[%s1593_s11 + $0x40] sm:$0xff]  ;;  %v612_v16 = vld [vmem:[%s1593_s11 + $0x38] sm:$0xff]  ;;  %v611_v17 = vld [vmem:[%s1593_s11 + $0x30] sm:$0xff] }
 0x10b   :  { %v256_v22 = vmul.f32 %v1417_v54, %v226_v18  ;;  %v258_v23 = vmul.f32 %v248_v19, %v1421_v56  ;;  %v227_v24 = vmul.f32 0.5, %v225_v20  ;;  %v249_v25 = vmul.f32 0.5, %v247_v21  ;;  %v610_v18 = vld [vmem:[%s1593_s11 + $0x28] sm:$0xff]  ;;  %v609_v19 = vld [vmem:[%s1593_s11 + $0x20] sm:$0xff]  ;;  %v608_v20 = vld [vmem:[%s1593_s11 + $0x18] sm:$0xff] }
 0x10c   :  { %v607_v21 = vld [vmem:[%s1593_s11 + $0x10] sm:$0xff] }
 0x10d   :  { %v257_v26 = vmul.f32 %v1417_v54, %v227_v24  ;;  %v259_v27 = vmul.f32 %v249_v25, %v1421_v56  ;;  %v260_v28 = vadd.f32 %v258_v23, %v256_v22  ;;  %v606_v22 = vld [vmem:[%s1593_s11 + $0x8] sm:$0xff]  ;;  %v605_v23 = vld [vmem:[%s1593_s11] sm:$0xff] }
 0x10f   :  { %v261_v31 = vadd.f32 %v259_v27, %v257_v26  ;;  %v264_v32 = vadd.f32 1e-05, %v260_v28  ;;  %v828_v28 = vld [vmem:[%s1590_s8] ss:$0 sm:$0xff] }
 0x111   :  { %v265_v33 = vadd.f32 1e-05, %v261_v31  ;;  %948 = vrsqrt.f32 %v264_v32 }
 0x113   :  { %950 = vrsqrt.f32 %v265_v33 }
 0x11e   :  { %v949_v45 = vpop.eup %948 }
 0x11f   :  { %v268_v36 = vmul.f32 %v949_v45, %v262_v29 }
 0x120   :  { %v951_v46 = vpop.eup %950 }
 0x121   :  { %v269_v48 = vmul.f32 %v951_v46, %v263_v30  ;;  %v281_v55 = vmul.f32 %v274_v44, %v268_v36 }
 0x123   :  { %v282_v57 = vmul.f32 %v278_v35, %v269_v48  ;;  %v294_v58 = vadd.f32 %v287_v47, %v281_v55 }
 0x125   :  { %v295_v60 = vadd.f32 %v291_v52, %v282_v57  ;;  %v296_v62 = vmax.f32 %v294_v58, 0.0 }
 0x127   :  { %v297_v61 = vmax.f32 %v295_v60, 0.0 }
 0x129   :  { %438 = vmatprep.mubr.f32.mxu1 %v297_v61 }
 0x12a   :  { %439 = vmatmul.mubr.f32.vlgmr.msra.gmra.mxu1 %v296_v62 }
 0x12b   :  { %940 = vmatprep.mubr.msk.f32.mxu1 %vm981_vm2, %v980_v4 }
 0x1ea   :  { %v440_v3 = vpop.f32.mrf.mxu1 }
 0x1eb   :  { %v441_v5 = vadd.f32 %v440_v3, %v367_v1 }
 0x1ec   :  { %v442_v6 = vpop.f32.mrf.mxu1 }
 0x1ed   :  { %v443_v7 = vadd.f32 %v442_v6, %v371_v2  ;;  %901 = vmatmul.mubr.f32.vlgmr.msra.gmra.mxu0 %v441_v5 }
 0x1ee   :  { %935 = vmatprep.mubr.msk.f32.mxu0 %vm981_vm2, %v980_v4  ;;  %904 = vmatpush3.msra.mxu0 %v620_v10 }
 0x1ef   :  { %v705_v8 = vmul.f32 %v443_v7, %v443_v7  ;;  %905 = vmatprep.subr.mxu0 %v980_v4 }
 0x1f0   :  { %906 = vmatpush3.msra.mxu0 %v619_v51 }
 0x1f1   :  { %v706_v9 = vsel %vm171_vm1, %v705_v8, 0.0  ;;  %907 = vmatprep.subr.mxu0 %v980_v4 }
 0x1f2   :  { %707 = vadd.xlane.f32.xlu0 %v706_v9  ;;  %908 = vmatpush3.msra.mxu0 %v618_v53 }
 0x1f3   :  { %909 = vmatprep.subr.mxu0 %v980_v4 }
 0x1f4   :  { %910 = vmatpush3.msra.mxu0 %v617_v11 }
 0x1f5   :  { %911 = vmatprep.subr.mxu0 %v980_v4 }
 0x1f6   :  { %912 = vmatpush3.msra.mxu0 %v616_v12 }
 0x1f7   :  { %913 = vmatprep.subr.mxu0 %v980_v4 }
 0x1f8   :  { %914 = vmatpush3.msra.mxu0 %v615_v13 }
 0x1f9   :  { %915 = vmatprep.subr.mxu0 %v980_v4 }
 0x1fa   :  { %916 = vmatpush3.msra.mxu0 %v614_v14 }
 0x1fb   :  { %917 = vmatprep.subr.mxu0 %v980_v4 }
 0x1fc   :  { %918 = vmatpush3.msra.mxu0 %v613_v15 }
 0x1fd   :  { %919 = vmatprep.subr.mxu0 %v980_v4 }
 0x1fe   :  { %920 = vmatpush3.msra.mxu0 %v612_v16 }
 0x1ff   :  { %921 = vmatprep.subr.mxu0 %v980_v4 }
 0x200   :  { %922 = vmatpush3.msra.mxu0 %v611_v17 }
 0x201   :  { %923 = vmatprep.subr.mxu0 %v980_v4 }
 0x202   :  { %924 = vmatpush3.msra.mxu0 %v610_v18 }
 0x203   :  { %925 = vmatprep.subr.mxu0 %v980_v4 }
 0x204   :  { %926 = vmatpush3.msra.mxu0 %v609_v19 }
 0x205   :  { %927 = vmatprep.subr.mxu0 %v980_v4 }
 0x206   :  { %928 = vmatpush3.msra.mxu0 %v608_v20 }
 0x207   :  { %929 = vmatprep.subr.mxu0 %v980_v4 }
 0x208   :  { %930 = vmatpush3.msra.mxu0 %v607_v21  ;;  %v829_v21 = vld [vmem:[%s1591_s9] ss:$0 sm:$0xff]  ;;  %s982_s9 = smov [#allocation2]  }
 0x209   :  { %931 = vmatprep.subr.mxu0 %v980_v4 }
 0x20a   :  { %932 = vmatpush3.msra.mxu0 %v606_v22 }
 0x20b   :  { %933 = vmatprep.subr.mxu0 %v980_v4 }
 0x20c   :  { %934 = vmatpush3.msra.mxu0 %v605_v23  ;;  %v830_v23 = vld [vmem:[%s1592_s10] ss:$0 sm:$0xff]  ;;  %s819_s10 = sshll.u32 %s982_s9, 4  ;;  %s820_s10 = int_to_ptr.vmem [resolvable:$true] %s819_s10 }
 0x20d   :  { %s958_s26 = scalar_lea.vmem %s820_s10, 16  ;;  %s962_s2 = scalar_lea.vmem %s820_s10, 32 }
 0x20e   :  { %p959_p0 = scmp.ne.s32.totalorder %s820_s10, %s958_s26  ;;  %p963_p1 = scmp.lt.s32.totalorder %s820_s10, %s820_s10 }
 0x20f   :  { %p964_p2 = scmp.lt.s32.totalorder %s962_s2, %s958_s26 }
 0x211   :  { %p965_p3 = por %p964_p2, %p963_p1 }
 0x213   :  { %p966_p4 = pnand %p965_p3, %p959_p0 }
 0x27b   :  { %v708_v24 = vpop.xlane.xlu0 %707 }
 0x27c   :  { %v709_v25 = vmax.f32 %v708_v24, 1e-24 }
 0x27e   :  { %952 = vrsqrt.f32 %v709_v25 }
 0x28b   :  { %v953_v26 = vpop.eup %952 }
 0x28c   :  { %v711_v27 = vmul.f32 %v953_v26, %v443_v7 }
 0x28e   :  { %939 = vmatpush3.xpose.msra.mxu1 %v711_v27 }
 0x2ad   :  { %v534_v31 = vpop.f32.mrf.mxu0 }
 0x2ae   :  { %v535_v32 = vadd.f32 %v828_v28, %v534_v31 }
 0x2af   :  { %v902_v33 = vpop.f32.mrf.mxu0 }
 0x2b0   :  { %v540_v34 = vmul.f32 %v1417_v54, %v535_v32  ;;  %v549_v37 = vmul.f32 %v535_v32, %v1421_v56 }
 0x2b2   :  { %v541_v4 = vsel %vm171_vm1, %v540_v34, 0.0  ;;  %v550_v38 = vsel %vm171_vm1, %v549_v37, 0.0 }
 0x2b3   :  { %v542_v39 = vrot.slane %v541_v4, 4  ;;  %v551_v40 = vrot.slane %v550_v38, 4 }
 0x2b5   :  { %v543_v41 = vadd.f32 %v542_v39, %v541_v4  ;;  %v552_v42 = vadd.f32 %v551_v40, %v550_v38  ;;  %v784_v38 = vadd.s32 2, %v1404_v50  ;;  %v783_v39 = vand.u32 127, %v80_v49 }
 0x2b7   :  { %v544_v43 = vrot.slane %v543_v41, 2  ;;  %v553_v44 = vrot.slane %v552_v42, 2  ;;  %v789_v40 = vand.u32 3, %v784_v38 }
 0x2b9   :  { %v545_v29 = vadd.f32 %v544_v43, %v543_v41  ;;  %v554_v45 = vadd.f32 %v553_v44, %v552_v42  ;;  %vm797_vm3 = vcmp.eq.s32.totalorder %v783_v39, %v789_v40 }
 0x2bb   :  { %v546_v30 = vrot.slane %v545_v29, 1  ;;  %v555_v35 = vrot.slane %v554_v45, 1 }
 0x2bd   :  { %v547_v36 = vadd.f32 %v546_v30, %v545_v29  ;;  %v556_v46 = vadd.f32 %v555_v35, %v554_v45 }
 0x2bf   :  { %v548_v47 = vmul.f32 0.5, %v547_v36  ;;  %v557_v48 = vmul.f32 0.5, %v556_v46 }
 0x2c1   :  { %v558_v52 = vsub.f32 %v535_v32, %v548_v47  ;;  %v569_v55 = vsub.f32 %v535_v32, %v557_v48  ;;  %v580_v16 = vmul.f32 %v1417_v54, %v548_v47  ;;  %v581_v17 = vmul.f32 %v557_v48, %v1421_v56 }
 0x2c3   :  { %v559_v57 = vmul.f32 %v558_v52, %v558_v52  ;;  %v570_v58 = vmul.f32 %v569_v55, %v569_v55  ;;  %v582_v18 = vadd.f32 %v581_v17, %v580_v16 }
 0x2c5   :  { %v560_v60 = vmul.f32 %v1417_v54, %v559_v57  ;;  %v571_v61 = vmul.f32 %v570_v58, %v1421_v56  ;;  %v586_v19 = vsub.f32 %v535_v32, %v582_v18 }
 0x2c7   :  { %v561_v62 = vsel %vm171_vm1, %v560_v60, 0.0  ;;  %v572_v59 = vsel %vm171_vm1, %v571_v61, 0.0 }
 0x2c8   :  { %v562_v63 = vrot.slane %v561_v62, 4  ;;  %v573_v0 = vrot.slane %v572_v59, 4 }
 0x2ca   :  { %v563_v1 = vadd.f32 %v562_v63, %v561_v62  ;;  %v574_v2 = vadd.f32 %v573_v0, %v572_v59 }
 0x2cc   :  { %v564_v3 = vrot.slane %v563_v1, 2  ;;  %v575_v5 = vrot.slane %v574_v2, 2 }
 0x2ce   :  { %v565_v6 = vadd.f32 %v564_v3, %v563_v1  ;;  %v576_v7 = vadd.f32 %v575_v5, %v574_v2 }
 0x2d0   :  { %v566_v8 = vrot.slane %v565_v6, 1  ;;  %v577_v9 = vrot.slane %v576_v7, 1 }
 0x2d2   :  { %v567_v10 = vadd.f32 %v566_v8, %v565_v6  ;;  %v578_v51 = vadd.f32 %v577_v9, %v576_v7 }
 0x2d4   :  { %v568_v53 = vmul.f32 0.5, %v567_v10  ;;  %v579_v11 = vmul.f32 0.5, %v578_v51 }
 0x2d6   :  { %v583_v12 = vmul.f32 %v1417_v54, %v568_v53  ;;  %v584_v13 = vmul.f32 %v579_v11, %v1421_v56  ;;  %v831_v54 = vld [vmem:[%s1594_s12] ss:$0 sm:$0xff] }
 0x2d8   :  { %v585_v14 = vadd.f32 %v584_v13, %v583_v12 }
 0x2da   :  { %v587_v15 = vadd.f32 1e-05, %v585_v14 }
 0x2dc   :  { %954 = vrsqrt.f32 %v587_v15 }
 0x2e9   :  { %v955_v20 = vpop.eup %954 }
 0x2ea   :  { %v589_v22 = vmul.f32 %v955_v20, %v586_v19 }
 0x2ec   :  { %v596_v24 = vmul.f32 %v829_v21, %v589_v22 }
 0x2ee   :  { %v603_v25 = vadd.f32 %v830_v23, %v596_v24 }
 0x2f0   :  { %v604_v26 = vmax.f32 %v603_v25, 0.0 }
 0x2f2   :  { %936 = vmatmul.mubr.f32.vlgmr.msra.gmra.mxu0 %v604_v26 }
 0x3b2   :  { %v694_v56 = vpop.f32.mrf.mxu0 }
 0x3b3   :  { %v695_v27 = vadd.f32 %v831_v54, %v694_v56 }
 0x3b4   :  { %v937_v28 = vpop.f32.mrf.mxu0 }
 0x3b5   :  { %v698_v31 = vmul.f32 %v695_v27, %v695_v27 }
 0x3b7   :  { %v699_v32 = vsel %vm171_vm1, %v698_v31, 0.0 }
 0x3b8   :  { %700 = vadd.xlane.f32.xlu0 %v699_v32 }
 0x441   :  { %v701_v33 = vpop.xlane.xlu0 %700 }
 0x442   :  { %v702_v34 = vmax.f32 %v701_v33, 1e-24 }
 0x444   :  { %956 = vrsqrt.f32 %v702_v34 }
 0x451   :  { %v957_v37 = vpop.eup %956 }
 0x452   :  { %v704_v4 = vmul.f32 %v957_v37, %v695_v27 }
 0x454   :  { %941 = vmatmul.mubr.f32.vlgmr.msra.gmra.mxu1 %v704_v4 }
 0x514   :  { %v778_v41 = vpop.f32.mrf.mxu1 }
 0x515   :  { %v798_v42 = vsel %vm797_vm3, %v778_v41, 0.0 }
 0x516   :  { %v942_v43 = vpop.f32.mrf.mxu1  ;;  %v800_v44 = vsel %vm799_vm4, %v798_v42, 0.0 }
 0x517   :  { %801 = vadd.xlane.f32.xlu1 %v800_v44 }
 0x5a0   :  { %v802_v29 = vpop.xlane.xlu1 %801 }
 0x5a1   :  { %v803_v45 = vrot.slane %v802_v29, 4 }
 0x5a3   :  { %v804_v30 = vadd.f32 %v803_v45, %v802_v29 }
 0x5a5   :  { %v805_v35 = vrot.slane %v804_v30, 2 }
 0x5a7   :  { %v806_v36 = vadd.f32 %v805_v35, %v804_v30 }
 0x5a9   :  { %v807_v46 = vrot.slane %v806_v36, 1 }
 0x5ab   :  { %v808_v47 = vadd.f32 %v807_v46, %v806_v36 }
 0x5ad   :  { %943 = vpush %v808_v47 }
 0x5de   :  { %s944_s12 = spop %943 }
 0x5df   :  { %s810_s25 = smul.f32 -1.0, %s944_s12 }
 0x5e1   :  { %v811_v49 = vstv %s810_s25 }
 0x5e2   :  { %812 = vst [vmem:[#allocation2] sm:$0x1] %v811_v49 }
 0x5e3   :  { %969 = shalt.err (!%p966_p4)
}
 0x5e4   :  { %822 = dma.vmem_to_hbm [thread:$0]  %s820_s10, 16, %s1595_s13, [#allocation3]  }
 0x5e5   :  { %978 = dma.done.wait [#allocation3], 16  }
 0x5e6   :  { %979 = vsyncadd [#allocation3], 4294967280 }
 0x5e7   :  { %826 = vsyncpa [#allocation3], 1 }

</bundles_post_ra>
